<compile_context>
chip_gen: v7x
topology: tpu7x:2x2x1
jax: 0.10.0
libtpu: 0.0.40
codegen_flags: <defaults>
</compile_context>

<pallas_src>
import functools
import numpy as np
import jax
import jax.numpy as jnp
from jax import lax
from jax.experimental import pallas as pl
from jax.experimental.pallas import tpu as pltpu


def _round8(n):
    return -(-n // 8) * 8


# ---------------------------------------------------------------------------
# Fused kernel
# ---------------------------------------------------------------------------
def _make_kernel(o11, o22, o32, g1, g2, g3, Cin, H, W):
    L_out = H * W              # output lanes (256 for H=W=16)
    L_buf = (H + 6) * W        # 3 zero rows above + 3 below, row stride = W
    OFF0 = 3 * W               # buffer flat index of output position (0, 0)

    def kernel(x_ref, w1f_ref, b1f_ref, w2s_ref, b2b_ref, w3s_ref, b3eff_ref,
               w4_ref, b4_ref, m2_ref, m3_ref, mt4_ref,
               o_ref, xpad_ref, scr2_ref, scr3_ref):
        # ---- in-kernel zero row-padding of x (replaces the wrapper jnp.pad) ----
        xpad_ref[...] = jnp.zeros((Cin, L_buf), jnp.float32)
        xpad_ref[:, OFF0:OFF0 + L_out] = x_ref[...]
        xb = xpad_ref[...]                                     # (Cin, L_buf)

        # ---- fused 1x1 convs (branch1 | branch2a | branch3a): one MXU matmul ----
        r = jnp.maximum(
            jnp.dot(w1f_ref[...], xb, preferred_element_type=jnp.float32)
            + b1f_ref[...], 0.0)                               # (g1+g2+g3, L_buf)

        # branch1 (1x1, pad 0): straight slice of the output-region lanes
        o_ref[0:o11, :] = r[0:o11, OFF0:OFF0 + L_out]

        # ---- per-column-shift pre-masked copies (row masks folded in) ----
        r2 = r[g1:g1 + g2, :]
        r3 = r[g1 + g2:g1 + g2 + g3, :]
        c2 = [r2 * m2_ref[s] for s in range(3)]                # shifts -1, 0, +1
        c3 = [r3 * m3_ref[s] for s in range(5)]                # shifts -2 .. +2

        # ---- branch2: 3x3 pad1 conv = 9 taps stacked along K, ONE matmul ----
        for kh in range(3):
            for kw in range(3):
                t = kh * 3 + kw
                off = (kh + 2) * W + (kw - 1)
                scr2_ref[t * g2:(t + 1) * g2, :] = c2[kw][:, off:off + L_out]
        x2 = jnp.maximum(
            jnp.dot(w2s_ref[...], scr2_ref[...],
                    preferred_element_type=jnp.float32) + b2b_ref[...], 0.0)
        o_ref[o11:o11 + o22, :] = x2

        # ---- branch3: 5x5 pad1 conv on the (H+2)x(W+2) t3 = 25 taps stacked,
        #      ONE matmul; t3's two un-stored ring COLUMNS are folded into the
        #      precomputed effective bias b3eff (its ring ROWS live in the buffer).
        for kh in range(5):
            for kw in range(5):
                t = kh * 5 + kw
                off = (kh + 1) * W + (kw - 2)
                scr3_ref[t * g3:(t + 1) * g3, :] = c3[kw][:, off:off + L_out]
        x3 = jnp.maximum(
            jnp.dot(w3s_ref[...], scr3_ref[...],
                    preferred_element_type=jnp.float32) + b3eff_ref[...], 0.0)
        o_ref[o11 + o22:o11 + o22 + o32, :] = x3

        # ---- branch4: 3x3/s1/p0 maxpool (balanced 9-tap max tree) + 1x1 pad1 ----
        taps = []
        for kh in range(3):
            for kw in range(3):
                off = (kh + 2) * W + (kw - 1)
                taps.append(xb[:, off:off + L_out])
        while len(taps) > 1:
            nxt = [jnp.maximum(taps[i], taps[i + 1])
                   for i in range(0, len(taps) - 1, 2)]
            if len(taps) % 2:
                nxt.append(taps[-1])
            taps = nxt
        t4 = taps[0] * mt4_ref[...]                            # zero border ring
        x4 = jnp.maximum(
            jnp.dot(w4_ref[...], t4,
                    preferred_element_type=jnp.float32) + b4_ref[...], 0.0)
        o_ref[o11 + o22 + o32:, :] = x4

    return kernel


# ---------------------------------------------------------------------------
# One-time weight / constant repacking (outside the hot jitted step)
# ---------------------------------------------------------------------------
def prepare_params(params, H, W):
    w1, c1 = params["b1"]
    w2a, c2a = params["b2a"]
    w2b, c2b = params["b2b"]
    w3a, c3a = params["b3a"]
    w3b, c3b = params["b3b"]
    w4, c4 = params["b4"]
    o11, o21, o22 = w1.shape[0], w2a.shape[0], w2b.shape[0]
    o31, o32, o42 = w3a.shape[0], w3b.shape[0], w4.shape[0]
    g1, g2, g3 = _round8(o11), _round8(o21), _round8(o31)

    L_out = H * W
    L_buf = (H + 6) * W

    def pad_rows(a, g):
        return jnp.pad(a, ((0, g - a.shape[0]),) + ((0, 0),) * (a.ndim - 1))

    # fused, 8-row-aligned 1x1 weights / biases: [b1 | b2a pad | b3a pad]
    w1f = jnp.concatenate([pad_rows(w1, g1), pad_rows(w2a, g2), pad_rows(w3a, g3)], 0)
    b1f = jnp.concatenate([pad_rows(c1, g1), pad_rows(c2a, g2), pad_rows(c3a, g3)], 0
                          ).reshape(-1, 1)

    # stacked conv weights: K-row order = (kh, kw, in-channel padded to g)
    def stack_w(w, g):
        O, I, KH, KW = w.shape
        wp = jnp.pad(w, ((0, 0), (0, g - I), (0, 0), (0, 0)))
        return jnp.transpose(wp, (0, 2, 3, 1)).reshape(O, KH * KW * g)
    w2s = stack_w(w2b, g2)                                     # (o22, 9*g2)
    w3s = stack_w(w3b, g3)                                     # (o32, 25*g3)

    # ---- compile-time constant masks ----
    f32 = np.float32
    i_idx = np.arange(L_out) // W
    j_idx = np.arange(L_out) % W
    a_row = np.arange(L_buf) // W
    a_col = np.arange(L_buf) % W
    row_x = ((a_row >= 3) & (a_row < 3 + H)).astype(f32)       # valid x rows
    row_t3 = ((a_row >= 2) & (a_row < 4 + H)).astype(f32)      # valid t3 rows

    def col_ok(d):            # buffer columns valid for a column shift of d
        if d > 0:
            return (a_col >= d).astype(f32)
        if d < 0:
            return (a_col < W + d).astype(f32)
        return np.ones(L_buf, f32)

    m2 = np.stack([row_x * col_ok(d) for d in (-1, 0, 1)], 0).reshape(3, 1, L_buf)
    m3 = np.stack([row_t3 * col_ok(d) for d in (-2, -1, 0, 1, 2)], 0).reshape(5, 1, L_buf)
    mt4 = (((i_idx >= 1) & (i_idx < H - 1) & (j_idx >= 1) & (j_idx < W - 1))
           .astype(f32).reshape(1, L_out))

    # branch3: the two t3 ring COLUMNS (value relu(b3a)) do not fit the W-stride
    # buffer; pre-reduce their whole contribution into an effective bias.
    ring = np.zeros((5, 5, L_out), f32)
    for kh in range(5):
        for kw in range(5):
            sh, sw = kh - 2, kw - 2
            ring[kh, kw] = (((j_idx + sw == -1) | (j_idx + sw == W)) &
                            (i_idx + sh >= -1) & (i_idx + sh < H + 1)).astype(f32)
    rc3 = jnp.einsum('oihw,i->ohw', w3b, jax.nn.relu(c3a))             # (o32, 5, 5)
    b3eff = jnp.einsum('ohw,hwp->op', rc3, jnp.asarray(ring)) + c3b[:, None]

    meta = (o11, o22, o32, o42, g1, g2, g3)
    arrays = dict(
        w1f=w1f, b1f=b1f,
        w2s=w2s, b2b=c2b.reshape(o22, 1),
        w3s=w3s, b3eff=b3eff,
        w4=w4, b4=c4.reshape(o42, 1),
        m2=jnp.asarray(m2), m3=jnp.asarray(m3), mt4=jnp.asarray(mt4))
    return meta, arrays


# ---------------------------------------------------------------------------
# Forward wrapper (jitted hot path: reshape -> pallas_call -> reshape)
# ---------------------------------------------------------------------------
def inception_forward(meta, x_nchw, arrays):
    o11, o22, o32, o42, g1, g2, g3 = meta
    N, Cin, H, W = x_nchw.shape
    C_total = o11 + o22 + o32 + o42
    L_out = H * W
    L_buf = (H + 6) * W

    x_flat = x_nchw.reshape(N, Cin, L_out)          # contiguous (free) reshape

    kernel = _make_kernel(o11, o22, o32, g1, g2, g3, Cin, H, W)

    def full(shape):
        return pl.BlockSpec(shape, lambda n, _s=len(shape): (0,) * _s)

    a = arrays
    in_specs = [
        pl.BlockSpec((None, Cin, L_out), lambda n: (n, 0, 0)),          # x
        full(a["w1f"].shape), full(a["b1f"].shape),
        full(a["w2s"].shape), full(a["b2b"].shape),
        full(a["w3s"].shape), full(a["b3eff"].shape),
        full(a["w4"].shape), full(a["b4"].shape),
        full(a["m2"].shape), full(a["m3"].shape), full(a["mt4"].shape),
    ]
    out_specs = pl.BlockSpec((None, C_total, L_out), lambda n: (n, 0, 0))

    y = pl.pallas_call(
        kernel,
        out_shape=jax.ShapeDtypeStruct((N, C_total, L_out), jnp.float32),
        grid=(N,),
        in_specs=in_specs,
        out_specs=out_specs,
        scratch_shapes=[pltpu.VMEM((Cin, L_buf), jnp.float32),      # row-padded x
                        pltpu.VMEM((9 * g2, L_out), jnp.float32),   # stacked 3x3 taps
                        pltpu.VMEM((25 * g3, L_out), jnp.float32)], # stacked 5x5 taps
        compiler_params=pltpu.CompilerParams(
            dimension_semantics=("parallel",)),
    )(x_flat, a["w1f"], a["b1f"], a["w2s"], a["b2b"], a["w3s"], a["b3eff"],
      a["w4"], a["b4"], a["m2"], a["m3"], a["mt4"])

    # (N, C_total, H*W) slab IS NCHW; reshape is contiguous (free).
    return y.reshape(N, C_total, H, W)


# ---------------------------------------------------------------------------
# Params (torch Conv2d-style init) and pure-JAX reference
# ---------------------------------------------------------------------------
def init_params(key, in_chan, o11, o21, o22, o31, o32, o42):
    def conv_p(k, cout, cin, kh, kw):
        kw_key, kb_key = jax.random.split(k)
        bound = 1.0 / float(np.sqrt(kh * kw * cin))
        shape = (cout, cin) if (kh == 1 and kw == 1) else (cout, cin, kh, kw)
        w = jax.random.uniform(kw_key, shape, jnp.float32, -bound, bound)
        b = jax.random.uniform(kb_key, (cout,), jnp.float32, -bound, bound)
        return w, b

    ks = jax.random.split(key, 6)
    return {
        "b1":  conv_p(ks[0], o11, in_chan, 1, 1),   # 1x1 pad0
        "b2a": conv_p(ks[1], o21, in_chan, 1, 1),   # 1x1 pad0
        "b2b": conv_p(ks[2], o22, o21, 3, 3),       # 3x3 pad1
        "b3a": conv_p(ks[3], o31, in_chan, 1, 1),   # 1x1 pad1 (!)
        "b3b": conv_p(ks[4], o32, o31, 5, 5),       # 5x5 pad1
        "b4":  conv_p(ks[5], o42, in_chan, 1, 1),   # 1x1 pad1 after 3x3/s1/p0 pool
    }


def _conv_relu_ref(x, w, b, padding):
    if w.ndim == 2:
        w = w[:, :, None, None]
    y = lax.conv_general_dilated(x, w, (1, 1), [(padding, padding)] * 2,
                                 dimension_numbers=("NCHW", "OIHW", "NCHW"))
    return jax.nn.relu(y + b.reshape(1, -1, 1, 1))


def inception_ref(x, params):
    w, b = params["b1"];  x1 = _conv_relu_ref(x, w, b, 0)
    w, b = params["b2a"]; t2 = _conv_relu_ref(x, w, b, 0)
    w, b = params["b2b"]; x2 = _conv_relu_ref(t2, w, b, 1)
    w, b = params["b3a"]; t3 = _conv_relu_ref(x, w, b, 1)
    w, b = params["b3b"]; x3 = _conv_relu_ref(t3, w, b, 1)
    t4 = lax.reduce_window(x, -jnp.inf, lax.max, (1, 1, 3, 3), (1, 1, 1, 1), "VALID")
    w, b = params["b4"];  x4 = _conv_relu_ref(t4, w, b, 1)
    return jnp.concatenate([x1, x2, x3, x4], axis=1)


if __name__ == "__main__":
    # inception(in_chan=4, out_bran11=8, out_bran21=4, out_bran22=8,
    #           out_bran31=4, out_bran32=8, out_bran42=8)
    in_chan, o11, o21, o22, o31, o32, o42 = 4, 8, 4, 8, 4, 8, 8
    N, H, W = 2, 16, 16

    key = jax.random.PRNGKey(0)
    kx, kp = jax.random.split(key)
    x = jax.random.normal(kx, (N, in_chan, H, W), jnp.float32)   # NCHW like torch
    params = init_params(kp, in_chan, o11, o21, o22, o31, o32, o42)

    meta, arrays = prepare_params(params, H, W)      # one-time weight repack
    fwd = jax.jit(functools.partial(inception_forward, meta))
    y = jax.block_until_ready(fwd(x, arrays))
    assert y.shape == (N, o11 + o22 + o32 + o42, H, W), y.shape

    y_ref = jax.block_until_ready(jax.jit(inception_ref)(x, params))
    assert jnp.allclose(y, y_ref, atol=1e-4, rtol=1e-4), \
        f"mismatch vs reference, max abs err = {jnp.max(jnp.abs(y - y_ref))}"

    print("KERNEL_OK")
</pallas_src>

<mosaic_0001>
module attributes {stable_mosaic.version = 11 : i64} {
  func.func @kernel(%arg0: i32, %arg1: memref<1x4x256xf32, #tpu.memory_space<vmem>>, %arg2: memref<24x4xf32, #tpu.memory_space<vmem>>, %arg3: memref<24x1xf32, #tpu.memory_space<vmem>>, %arg4: memref<8x72xf32, #tpu.memory_space<vmem>>, %arg5: memref<8x1xf32, #tpu.memory_space<vmem>>, %arg6: memref<8x200xf32, #tpu.memory_space<vmem>>, %arg7: memref<8x256xf32, #tpu.memory_space<vmem>>, %arg8: memref<8x4xf32, #tpu.memory_space<vmem>>, %arg9: memref<8x1xf32, #tpu.memory_space<vmem>>, %arg10: memref<3x1x352xf32, #tpu.memory_space<vmem>>, %arg11: memref<5x1x352xf32, #tpu.memory_space<vmem>>, %arg12: memref<1x256xf32, #tpu.memory_space<vmem>>, %arg13: memref<1x32x256xf32, #tpu.memory_space<vmem>>, %arg14: memref<4x352xf32, #tpu.memory_space<vmem>>, %arg15: memref<72x256xf32, #tpu.memory_space<vmem>>, %arg16: memref<200x256xf32, #tpu.memory_space<vmem>>) attributes {dimension_semantics = [#tpu.dimension_semantics<parallel>], iteration_bounds = array<i64: 2>, scalar_prefetch = 0 : i64, scratch_operands = 3 : i64, tpu.core_type = #tpu.core_type<tc>, window_params = [{transform_indices = @transform_0, window_bounds = array<i64: 1, 4, 256>}, {pipeline_mode = #tpu.pipeline_mode<synchronous>, transform_indices = @transform_1, window_bounds = array<i64: 24, 4>}, {pipeline_mode = #tpu.pipeline_mode<synchronous>, transform_indices = @transform_2, window_bounds = array<i64: 24, 1>}, {pipeline_mode = #tpu.pipeline_mode<synchronous>, transform_indices = @transform_3, window_bounds = array<i64: 8, 72>}, {pipeline_mode = #tpu.pipeline_mode<synchronous>, transform_indices = @transform_4, window_bounds = array<i64: 8, 1>}, {pipeline_mode = #tpu.pipeline_mode<synchronous>, transform_indices = @transform_5, window_bounds = array<i64: 8, 200>}, {pipeline_mode = #tpu.pipeline_mode<synchronous>, transform_indices = @transform_6, window_bounds = array<i64: 8, 256>}, {pipeline_mode = #tpu.pipeline_mode<synchronous>, transform_indices = @transform_7, window_bounds = array<i64: 8, 4>}, {pipeline_mode = #tpu.pipeline_mode<synchronous>, transform_indices = @transform_8, window_bounds = array<i64: 8, 1>}, {pipeline_mode = #tpu.pipeline_mode<synchronous>, transform_indices = @transform_9, window_bounds = array<i64: 3, 1, 352>}, {pipeline_mode = #tpu.pipeline_mode<synchronous>, transform_indices = @transform_10, window_bounds = array<i64: 5, 1, 352>}, {pipeline_mode = #tpu.pipeline_mode<synchronous>, transform_indices = @transform_11, window_bounds = array<i64: 1, 256>}, {transform_indices = @transform_12, window_bounds = array<i64: 1, 32, 256>}]} {
    %cst = arith.constant 0.000000e+00 : f32
    %0 = vector.broadcast %cst : f32 to vector<4x352xf32>
    %c0 = arith.constant 0 : index
    %c0_0 = arith.constant 0 : index
    %1 = vector.load %arg14[%c0, %c0_0] : memref<4x352xf32, #tpu.memory_space<vmem>>, vector<4x352xf32>
    tpu.vector_store %arg14[%c0, %c0_0], %0 {strides = array<i32>} : memref<4x352xf32, #tpu.memory_space<vmem>>, vector<4x352xf32>,
    %c0_1 = arith.constant 0 : index
    %c0_2 = arith.constant 0 : index
    %c0_3 = arith.constant 0 : index
    %2 = vector.load %arg1[%c0_1, %c0_2, %c0_3] : memref<1x4x256xf32, #tpu.memory_space<vmem>>, vector<1x4x256xf32>
    %3 = vector.shape_cast %2 : vector<1x4x256xf32> to vector<4x256xf32>
    %c0_4 = arith.constant 0 : index
    %c48 = arith.constant 48 : index
    %4 = vector.load %arg14[%c0_4, %c48] : memref<4x352xf32, #tpu.memory_space<vmem>>, vector<4x256xf32>
    tpu.vector_store %arg14[%c0_4, %c48], %3 {strides = array<i32>} : memref<4x352xf32, #tpu.memory_space<vmem>>, vector<4x256xf32>,
    %c0_5 = arith.constant 0 : index
    %c0_6 = arith.constant 0 : index
    %5 = vector.load %arg14[%c0_5, %c0_6] : memref<4x352xf32, #tpu.memory_space<vmem>>, vector<4x352xf32>
    %c0_7 = arith.constant 0 : index
    %c0_8 = arith.constant 0 : index
    %6 = vector.load %arg2[%c0_7, %c0_8] : memref<24x4xf32, #tpu.memory_space<vmem>>, vector<24x4xf32>
    %cst_9 = arith.constant dense<0.000000e+00> : vector<24x352xf32>
    %7 = tpu.matmul %6, %5, %cst_9 {dimension_numbers = #tpu.dot_dimension_numbers<[1], [0], [0], [1], [0, 0, 1, 1], [], []>} : vector<24x4xf32>, vector<4x352xf32>, vector<24x352xf32> -> vector<24x352xf32>
    %c0_10 = arith.constant 0 : index
    %c0_11 = arith.constant 0 : index
    %8 = vector.load %arg3[%c0_10, %c0_11] : memref<24x1xf32, #tpu.memory_space<vmem>>, vector<24x1xf32>
    %9 = vector.broadcast %8 : vector<24x1xf32> to vector<24x352xf32>
    %10 = arith.addf %7, %9 : vector<24x352xf32>
    %cst_12 = arith.constant 0.000000e+00 : f32
    %11 = vector.broadcast %cst_12 : f32 to vector<24x352xf32>
    %12 = arith.maximumf %10, %11 : vector<24x352xf32>
    %13 = vector.extract_strided_slice %12 {offsets = [0, 48], sizes = [8, 256], strides = [1, 1]} : vector<24x352xf32> to vector<8x256xf32>
    %c0_13 = arith.constant 0 : index
    %c0_14 = arith.constant 0 : index
    %c0_15 = arith.constant 0 : index
    %14 = vector.load %arg13[%c0_13, %c0_14, %c0_15] : memref<1x32x256xf32, #tpu.memory_space<vmem>>, vector<1x8x256xf32>
    %15 = vector.shape_cast %14 : vector<1x8x256xf32> to vector<8x256xf32>
    %16 = vector.shape_cast %13 : vector<8x256xf32> to vector<1x8x256xf32>
    tpu.vector_store %arg13[%c0_13, %c0_14, %c0_15], %16 {strides = array<i32>} : memref<1x32x256xf32, #tpu.memory_space<vmem>>, vector<1x8x256xf32>,
    %17 = vector.extract_strided_slice %12 {offsets = [8, 0], sizes = [8, 352], strides = [1, 1]} : vector<24x352xf32> to vector<8x352xf32>
    %18 = vector.extract_strided_slice %12 {offsets = [16, 0], sizes = [8, 352], strides = [1, 1]} : vector<24x352xf32> to vector<8x352xf32>
    %c0_16 = arith.constant 0 : index
    %c0_17 = arith.constant 0 : index
    %c0_18 = arith.constant 0 : index
    %19 = vector.load %arg10[%c0_16, %c0_17, %c0_18] : memref<3x1x352xf32, #tpu.memory_space<vmem>>, vector<1x1x352xf32>
    %20 = vector.shape_cast %19 : vector<1x1x352xf32> to vector<1x352xf32>
    %21 = vector.broadcast %20 : vector<1x352xf32> to vector<8x352xf32>
    %22 = arith.mulf %17, %21 : vector<8x352xf32>
    %c1 = arith.constant 1 : index
    %c0_19 = arith.constant 0 : index
    %c0_20 = arith.constant 0 : index
    %23 = vector.load %arg10[%c1, %c0_19, %c0_20] : memref<3x1x352xf32, #tpu.memory_space<vmem>>, vector<1x1x352xf32>
    %24 = vector.shape_cast %23 : vector<1x1x352xf32> to vector<1x352xf32>
    %25 = vector.broadcast %24 : vector<1x352xf32> to vector<8x352xf32>
    %26 = arith.mulf %17, %25 : vector<8x352xf32>
    %c2 = arith.constant 2 : index
    %c0_21 = arith.constant 0 : index
    %c0_22 = arith.constant 0 : index
    %27 = vector.load %arg10[%c2, %c0_21, %c0_22] : memref<3x1x352xf32, #tpu.memory_space<vmem>>, vector<1x1x352xf32>
    %28 = vector.shape_cast %27 : vector<1x1x352xf32> to vector<1x352xf32>
    %29 = vector.broadcast %28 : vector<1x352xf32> to vector<8x352xf32>
    %30 = arith.mulf %17, %29 : vector<8x352xf32>
    %c0_23 = arith.constant 0 : index
    %c0_24 = arith.constant 0 : index
    %c0_25 = arith.constant 0 : index
    %31 = vector.load %arg11[%c0_23, %c0_24, %c0_25] : memref<5x1x352xf32, #tpu.memory_space<vmem>>, vector<1x1x352xf32>
    %32 = vector.shape_cast %31 : vector<1x1x352xf32> to vector<1x352xf32>
    %33 = vector.broadcast %32 : vector<1x352xf32> to vector<8x352xf32>
    %34 = arith.mulf %18, %33 : vector<8x352xf32>
    %c1_26 = arith.constant 1 : index
    %c0_27 = arith.constant 0 : index
    %c0_28 = arith.constant 0 : index
    %35 = vector.load %arg11[%c1_26, %c0_27, %c0_28] : memref<5x1x352xf32, #tpu.memory_space<vmem>>, vector<1x1x352xf32>
    %36 = vector.shape_cast %35 : vector<1x1x352xf32> to vector<1x352xf32>
    %37 = vector.broadcast %36 : vector<1x352xf32> to vector<8x352xf32>
    %38 = arith.mulf %18, %37 : vector<8x352xf32>
    %c2_29 = arith.constant 2 : index
    %c0_30 = arith.constant 0 : index
    %c0_31 = arith.constant 0 : index
    %39 = vector.load %arg11[%c2_29, %c0_30, %c0_31] : memref<5x1x352xf32, #tpu.memory_space<vmem>>, vector<1x1x352xf32>
    %40 = vector.shape_cast %39 : vector<1x1x352xf32> to vector<1x352xf32>
    %41 = vector.broadcast %40 : vector<1x352xf32> to vector<8x352xf32>
    %42 = arith.mulf %18, %41 : vector<8x352xf32>
    %c3 = arith.constant 3 : index
    %c0_32 = arith.constant 0 : index
    %c0_33 = arith.constant 0 : index
    %43 = vector.load %arg11[%c3, %c0_32, %c0_33] : memref<5x1x352xf32, #tpu.memory_space<vmem>>, vector<1x1x352xf32>
    %44 = vector.shape_cast %43 : vector<1x1x352xf32> to vector<1x352xf32>
    %45 = vector.broadcast %44 : vector<1x352xf32> to vector<8x352xf32>
    %46 = arith.mulf %18, %45 : vector<8x352xf32>
    %c4 = arith.constant 4 : index
    %c0_34 = arith.constant 0 : index
    %c0_35 = arith.constant 0 : index
    %47 = vector.load %arg11[%c4, %c0_34, %c0_35] : memref<5x1x352xf32, #tpu.memory_space<vmem>>, vector<1x1x352xf32>
    %48 = vector.shape_cast %47 : vector<1x1x352xf32> to vector<1x352xf32>
    %49 = vector.broadcast %48 : vector<1x352xf32> to vector<8x352xf32>
    %50 = arith.mulf %18, %49 : vector<8x352xf32>
    %51 = vector.extract_strided_slice %22 {offsets = [0, 31], sizes = [8, 256], strides = [1, 1]} : vector<8x352xf32> to vector<8x256xf32>
    %c0_36 = arith.constant 0 : index
    %c0_37 = arith.constant 0 : index
    %52 = vector.load %arg15[%c0_36, %c0_37] : memref<72x256xf32, #tpu.memory_space<vmem>>, vector<8x256xf32>
    tpu.vector_store %arg15[%c0_36, %c0_37], %51 {strides = array<i32>} : memref<72x256xf32, #tpu.memory_space<vmem>>, vector<8x256xf32>,
    %53 = vector.extract_strided_slice %26 {offsets = [0, 32], sizes = [8, 256], strides = [1, 1]} : vector<8x352xf32> to vector<8x256xf32>
    %c8 = arith.constant 8 : index
    %c0_38 = arith.constant 0 : index
    %54 = vector.load %arg15[%c8, %c0_38] : memref<72x256xf32, #tpu.memory_space<vmem>>, vector<8x256xf32>
    tpu.vector_store %arg15[%c8, %c0_38], %53 {strides = array<i32>} : memref<72x256xf32, #tpu.memory_space<vmem>>, vector<8x256xf32>,
    %55 = vector.extract_strided_slice %30 {offsets = [0, 33], sizes = [8, 256], strides = [1, 1]} : vector<8x352xf32> to vector<8x256xf32>
    %c16 = arith.constant 16 : index
    %c0_39 = arith.constant 0 : index
    %56 = vector.load %arg15[%c16, %c0_39] : memref<72x256xf32, #tpu.memory_space<vmem>>, vector<8x256xf32>
    tpu.vector_store %arg15[%c16, %c0_39], %55 {strides = array<i32>} : memref<72x256xf32, #tpu.memory_space<vmem>>, vector<8x256xf32>,
    %57 = vector.extract_strided_slice %22 {offsets = [0, 47], sizes = [8, 256], strides = [1, 1]} : vector<8x352xf32> to vector<8x256xf32>
    %c24 = arith.constant 24 : index
    %c0_40 = arith.constant 0 : index
    %58 = vector.load %arg15[%c24, %c0_40] : memref<72x256xf32, #tpu.memory_space<vmem>>, vector<8x256xf32>
    tpu.vector_store %arg15[%c24, %c0_40], %57 {strides = array<i32>} : memref<72x256xf32, #tpu.memory_space<vmem>>, vector<8x256xf32>,
    %59 = vector.extract_strided_slice %26 {offsets = [0, 48], sizes = [8, 256], strides = [1, 1]} : vector<8x352xf32> to vector<8x256xf32>
    %c32 = arith.constant 32 : index
    %c0_41 = arith.constant 0 : index
    %60 = vector.load %arg15[%c32, %c0_41] : memref<72x256xf32, #tpu.memory_space<vmem>>, vector<8x256xf32>
    tpu.vector_store %arg15[%c32, %c0_41], %59 {strides = array<i32>} : memref<72x256xf32, #tpu.memory_space<vmem>>, vector<8x256xf32>,
    %61 = vector.extract_strided_slice %30 {offsets = [0, 49], sizes = [8, 256], strides = [1, 1]} : vector<8x352xf32> to vector<8x256xf32>
    %c40 = arith.constant 40 : index
    %c0_42 = arith.constant 0 : index
    %62 = vector.load %arg15[%c40, %c0_42] : memref<72x256xf32, #tpu.memory_space<vmem>>, vector<8x256xf32>
    tpu.vector_store %arg15[%c40, %c0_42], %61 {strides = array<i32>} : memref<72x256xf32, #tpu.memory_space<vmem>>, vector<8x256xf32>,
    %63 = vector.extract_strided_slice %22 {offsets = [0, 63], sizes = [8, 256], strides = [1, 1]} : vector<8x352xf32> to vector<8x256xf32>
    %c48_43 = arith.constant 48 : index
    %c0_44 = arith.constant 0 : index
    %64 = vector.load %arg15[%c48_43, %c0_44] : memref<72x256xf32, #tpu.memory_space<vmem>>, vector<8x256xf32>
    tpu.vector_store %arg15[%c48_43, %c0_44], %63 {strides = array<i32>} : memref<72x256xf32, #tpu.memory_space<vmem>>, vector<8x256xf32>,
    %65 = vector.extract_strided_slice %26 {offsets = [0, 64], sizes = [8, 256], strides = [1, 1]} : vector<8x352xf32> to vector<8x256xf32>
    %c56 = arith.constant 56 : index
    %c0_45 = arith.constant 0 : index
    %66 = vector.load %arg15[%c56, %c0_45] : memref<72x256xf32, #tpu.memory_space<vmem>>, vector<8x256xf32>
    tpu.vector_store %arg15[%c56, %c0_45], %65 {strides = array<i32>} : memref<72x256xf32, #tpu.memory_space<vmem>>, vector<8x256xf32>,
    %67 = vector.extract_strided_slice %30 {offsets = [0, 65], sizes = [8, 256], strides = [1, 1]} : vector<8x352xf32> to vector<8x256xf32>
    %c64 = arith.constant 64 : index
    %c0_46 = arith.constant 0 : index
    %68 = vector.load %arg15[%c64, %c0_46] : memref<72x256xf32, #tpu.memory_space<vmem>>, vector<8x256xf32>
    tpu.vector_store %arg15[%c64, %c0_46], %67 {strides = array<i32>} : memref<72x256xf32, #tpu.memory_space<vmem>>, vector<8x256xf32>,
    %c0_47 = arith.constant 0 : index
    %c0_48 = arith.constant 0 : index
    %69 = vector.load %arg4[%c0_47, %c0_48] : memref<8x72xf32, #tpu.memory_space<vmem>>, vector<8x72xf32>
    %c0_49 = arith.constant 0 : index
    %c0_50 = arith.constant 0 : index
    %70 = vector.load %arg15[%c0_49, %c0_50] : memref<72x256xf32, #tpu.memory_space<vmem>>, vector<72x256xf32>
    %cst_51 = arith.constant dense<0.000000e+00> : vector<8x256xf32>
    %71 = tpu.matmul %69, %70, %cst_51 {dimension_numbers = #tpu.dot_dimension_numbers<[1], [0], [0], [1], [0, 0, 1, 1], [], []>} : vector<8x72xf32>, vector<72x256xf32>, vector<8x256xf32> -> vector<8x256xf32>
    %c0_52 = arith.constant 0 : index
    %c0_53 = arith.constant 0 : index
    %72 = vector.load %arg5[%c0_52, %c0_53] : memref<8x1xf32, #tpu.memory_space<vmem>>, vector<8x1xf32>
    %73 = vector.broadcast %72 : vector<8x1xf32> to vector<8x256xf32>
    %74 = arith.addf %71, %73 : vector<8x256xf32>
    %cst_54 = arith.constant 0.000000e+00 : f32
    %75 = vector.broadcast %cst_54 : f32 to vector<8x256xf32>
    %76 = arith.maximumf %74, %75 : vector<8x256xf32>
    %c0_55 = arith.constant 0 : index
    %c8_56 = arith.constant 8 : index
    %c0_57 = arith.constant 0 : index
    %77 = vector.load %arg13[%c0_55, %c8_56, %c0_57] : memref<1x32x256xf32, #tpu.memory_space<vmem>>, vector<1x8x256xf32>
    %78 = vector.shape_cast %77 : vector<1x8x256xf32> to vector<8x256xf32>
    %79 = vector.shape_cast %76 : vector<8x256xf32> to vector<1x8x256xf32>
    tpu.vector_store %arg13[%c0_55, %c8_56, %c0_57], %79 {strides = array<i32>} : memref<1x32x256xf32, #tpu.memory_space<vmem>>, vector<1x8x256xf32>,
    %80 = vector.extract_strided_slice %34 {offsets = [0, 14], sizes = [8, 256], strides = [1, 1]} : vector<8x352xf32> to vector<8x256xf32>
    %c0_58 = arith.constant 0 : index
    %c0_59 = arith.constant 0 : index
    %81 = vector.load %arg16[%c0_58, %c0_59] : memref<200x256xf32, #tpu.memory_space<vmem>>, vector<8x256xf32>
    tpu.vector_store %arg16[%c0_58, %c0_59], %80 {strides = array<i32>} : memref<200x256xf32, #tpu.memory_space<vmem>>, vector<8x256xf32>,
    %82 = vector.extract_strided_slice %38 {offsets = [0, 15], sizes = [8, 256], strides = [1, 1]} : vector<8x352xf32> to vector<8x256xf32>
    %c8_60 = arith.constant 8 : index
    %c0_61 = arith.constant 0 : index
    %83 = vector.load %arg16[%c8_60, %c0_61] : memref<200x256xf32, #tpu.memory_space<vmem>>, vector<8x256xf32>
    tpu.vector_store %arg16[%c8_60, %c0_61], %82 {strides = array<i32>} : memref<200x256xf32, #tpu.memory_space<vmem>>, vector<8x256xf32>,
    %84 = vector.extract_strided_slice %42 {offsets = [0, 16], sizes = [8, 256], strides = [1, 1]} : vector<8x352xf32> to vector<8x256xf32>
    %c16_62 = arith.constant 16 : index
    %c0_63 = arith.constant 0 : index
    %85 = vector.load %arg16[%c16_62, %c0_63] : memref<200x256xf32, #tpu.memory_space<vmem>>, vector<8x256xf32>
    tpu.vector_store %arg16[%c16_62, %c0_63], %84 {strides = array<i32>} : memref<200x256xf32, #tpu.memory_space<vmem>>, vector<8x256xf32>,
    %86 = vector.extract_strided_slice %46 {offsets = [0, 17], sizes = [8, 256], strides = [1, 1]} : vector<8x352xf32> to vector<8x256xf32>
    %c24_64 = arith.constant 24 : index
    %c0_65 = arith.constant 0 : index
    %87 = vector.load %arg16[%c24_64, %c0_65] : memref<200x256xf32, #tpu.memory_space<vmem>>, vector<8x256xf32>
    tpu.vector_store %arg16[%c24_64, %c0_65], %86 {strides = array<i32>} : memref<200x256xf32, #tpu.memory_space<vmem>>, vector<8x256xf32>,
    %88 = vector.extract_strided_slice %50 {offsets = [0, 18], sizes = [8, 256], strides = [1, 1]} : vector<8x352xf32> to vector<8x256xf32>
    %c32_66 = arith.constant 32 : index
    %c0_67 = arith.constant 0 : index
    %89 = vector.load %arg16[%c32_66, %c0_67] : memref<200x256xf32, #tpu.memory_space<vmem>>, vector<8x256xf32>
    tpu.vector_store %arg16[%c32_66, %c0_67], %88 {strides = array<i32>} : memref<200x256xf32, #tpu.memory_space<vmem>>, vector<8x256xf32>,
    %90 = vector.extract_strided_slice %34 {offsets = [0, 30], sizes = [8, 256], strides = [1, 1]} : vector<8x352xf32> to vector<8x256xf32>
    %c40_68 = arith.constant 40 : index
    %c0_69 = arith.constant 0 : index
    %91 = vector.load %arg16[%c40_68, %c0_69] : memref<200x256xf32, #tpu.memory_space<vmem>>, vector<8x256xf32>
    tpu.vector_store %arg16[%c40_68, %c0_69], %90 {strides = array<i32>} : memref<200x256xf32, #tpu.memory_space<vmem>>, vector<8x256xf32>,
    %92 = vector.extract_strided_slice %38 {offsets = [0, 31], sizes = [8, 256], strides = [1, 1]} : vector<8x352xf32> to vector<8x256xf32>
    %c48_70 = arith.constant 48 : index
    %c0_71 = arith.constant 0 : index
    %93 = vector.load %arg16[%c48_70, %c0_71] : memref<200x256xf32, #tpu.memory_space<vmem>>, vector<8x256xf32>
    tpu.vector_store %arg16[%c48_70, %c0_71], %92 {strides = array<i32>} : memref<200x256xf32, #tpu.memory_space<vmem>>, vector<8x256xf32>,
    %94 = vector.extract_strided_slice %42 {offsets = [0, 32], sizes = [8, 256], strides = [1, 1]} : vector<8x352xf32> to vector<8x256xf32>
    %c56_72 = arith.constant 56 : index
    %c0_73 = arith.constant 0 : index
    %95 = vector.load %arg16[%c56_72, %c0_73] : memref<200x256xf32, #tpu.memory_space<vmem>>, vector<8x256xf32>
    tpu.vector_store %arg16[%c56_72, %c0_73], %94 {strides = array<i32>} : memref<200x256xf32, #tpu.memory_space<vmem>>, vector<8x256xf32>,
    %96 = vector.extract_strided_slice %46 {offsets = [0, 33], sizes = [8, 256], strides = [1, 1]} : vector<8x352xf32> to vector<8x256xf32>
    %c64_74 = arith.constant 64 : index
    %c0_75 = arith.constant 0 : index
    %97 = vector.load %arg16[%c64_74, %c0_75] : memref<200x256xf32, #tpu.memory_space<vmem>>, vector<8x256xf32>
    tpu.vector_store %arg16[%c64_74, %c0_75], %96 {strides = array<i32>} : memref<200x256xf32, #tpu.memory_space<vmem>>, vector<8x256xf32>,
    %98 = vector.extract_strided_slice %50 {offsets = [0, 34], sizes = [8, 256], strides = [1, 1]} : vector<8x352xf32> to vector<8x256xf32>
    %c72 = arith.constant 72 : index
    %c0_76 = arith.constant 0 : index
    %99 = vector.load %arg16[%c72, %c0_76] : memref<200x256xf32, #tpu.memory_space<vmem>>, vector<8x256xf32>
    tpu.vector_store %arg16[%c72, %c0_76], %98 {strides = array<i32>} : memref<200x256xf32, #tpu.memory_space<vmem>>, vector<8x256xf32>,
    %100 = vector.extract_strided_slice %34 {offsets = [0, 46], sizes = [8, 256], strides = [1, 1]} : vector<8x352xf32> to vector<8x256xf32>
    %c80 = arith.constant 80 : index
    %c0_77 = arith.constant 0 : index
    %101 = vector.load %arg16[%c80, %c0_77] : memref<200x256xf32, #tpu.memory_space<vmem>>, vector<8x256xf32>
    tpu.vector_store %arg16[%c80, %c0_77], %100 {strides = array<i32>} : memref<200x256xf32, #tpu.memory_space<vmem>>, vector<8x256xf32>,
    %102 = vector.extract_strided_slice %38 {offsets = [0, 47], sizes = [8, 256], strides = [1, 1]} : vector<8x352xf32> to vector<8x256xf32>
    %c88 = arith.constant 88 : index
    %c0_78 = arith.constant 0 : index
    %103 = vector.load %arg16[%c88, %c0_78] : memref<200x256xf32, #tpu.memory_space<vmem>>, vector<8x256xf32>
    tpu.vector_store %arg16[%c88, %c0_78], %102 {strides = array<i32>} : memref<200x256xf32, #tpu.memory_space<vmem>>, vector<8x256xf32>,
    %104 = vector.extract_strided_slice %42 {offsets = [0, 48], sizes = [8, 256], strides = [1, 1]} : vector<8x352xf32> to vector<8x256xf32>
    %c96 = arith.constant 96 : index
    %c0_79 = arith.constant 0 : index
    %105 = vector.load %arg16[%c96, %c0_79] : memref<200x256xf32, #tpu.memory_space<vmem>>, vector<8x256xf32>
    tpu.vector_store %arg16[%c96, %c0_79], %104 {strides = array<i32>} : memref<200x256xf32, #tpu.memory_space<vmem>>, vector<8x256xf32>,
    %106 = vector.extract_strided_slice %46 {offsets = [0, 49], sizes = [8, 256], strides = [1, 1]} : vector<8x352xf32> to vector<8x256xf32>
    %c104 = arith.constant 104 : index
    %c0_80 = arith.constant 0 : index
    %107 = vector.load %arg16[%c104, %c0_80] : memref<200x256xf32, #tpu.memory_space<vmem>>, vector<8x256xf32>
    tpu.vector_store %arg16[%c104, %c0_80], %106 {strides = array<i32>} : memref<200x256xf32, #tpu.memory_space<vmem>>, vector<8x256xf32>,
    %108 = vector.extract_strided_slice %50 {offsets = [0, 50], sizes = [8, 256], strides = [1, 1]} : vector<8x352xf32> to vector<8x256xf32>
    %c112 = arith.constant 112 : index
    %c0_81 = arith.constant 0 : index
    %109 = vector.load %arg16[%c112, %c0_81] : memref<200x256xf32, #tpu.memory_space<vmem>>, vector<8x256xf32>
    tpu.vector_store %arg16[%c112, %c0_81], %108 {strides = array<i32>} : memref<200x256xf32, #tpu.memory_space<vmem>>, vector<8x256xf32>,
    %110 = vector.extract_strided_slice %34 {offsets = [0, 62], sizes = [8, 256], strides = [1, 1]} : vector<8x352xf32> to vector<8x256xf32>
    %c120 = arith.constant 120 : index
    %c0_82 = arith.constant 0 : index
    %111 = vector.load %arg16[%c120, %c0_82] : memref<200x256xf32, #tpu.memory_space<vmem>>, vector<8x256xf32>
    tpu.vector_store %arg16[%c120, %c0_82], %110 {strides = array<i32>} : memref<200x256xf32, #tpu.memory_space<vmem>>, vector<8x256xf32>,
    %112 = vector.extract_strided_slice %38 {offsets = [0, 63], sizes = [8, 256], strides = [1, 1]} : vector<8x352xf32> to vector<8x256xf32>
    %c128 = arith.constant 128 : index
    %c0_83 = arith.constant 0 : index
    %113 = vector.load %arg16[%c128, %c0_83] : memref<200x256xf32, #tpu.memory_space<vmem>>, vector<8x256xf32>
    tpu.vector_store %arg16[%c128, %c0_83], %112 {strides = array<i32>} : memref<200x256xf32, #tpu.memory_space<vmem>>, vector<8x256xf32>,
    %114 = vector.extract_strided_slice %42 {offsets = [0, 64], sizes = [8, 256], strides = [1, 1]} : vector<8x352xf32> to vector<8x256xf32>
    %c136 = arith.constant 136 : index
    %c0_84 = arith.constant 0 : index
    %115 = vector.load %arg16[%c136, %c0_84] : memref<200x256xf32, #tpu.memory_space<vmem>>, vector<8x256xf32>
    tpu.vector_store %arg16[%c136, %c0_84], %114 {strides = array<i32>} : memref<200x256xf32, #tpu.memory_space<vmem>>, vector<8x256xf32>,
    %116 = vector.extract_strided_slice %46 {offsets = [0, 65], sizes = [8, 256], strides = [1, 1]} : vector<8x352xf32> to vector<8x256xf32>
    %c144 = arith.constant 144 : index
    %c0_85 = arith.constant 0 : index
    %117 = vector.load %arg16[%c144, %c0_85] : memref<200x256xf32, #tpu.memory_space<vmem>>, vector<8x256xf32>
    tpu.vector_store %arg16[%c144, %c0_85], %116 {strides = array<i32>} : memref<200x256xf32, #tpu.memory_space<vmem>>, vector<8x256xf32>,
    %118 = vector.extract_strided_slice %50 {offsets = [0, 66], sizes = [8, 256], strides = [1, 1]} : vector<8x352xf32> to vector<8x256xf32>
    %c152 = arith.constant 152 : index
    %c0_86 = arith.constant 0 : index
    %119 = vector.load %arg16[%c152, %c0_86] : memref<200x256xf32, #tpu.memory_space<vmem>>, vector<8x256xf32>
    tpu.vector_store %arg16[%c152, %c0_86], %118 {strides = array<i32>} : memref<200x256xf32, #tpu.memory_space<vmem>>, vector<8x256xf32>,
    %120 = vector.extract_strided_slice %34 {offsets = [0, 78], sizes = [8, 256], strides = [1, 1]} : vector<8x352xf32> to vector<8x256xf32>
    %c160 = arith.constant 160 : index
    %c0_87 = arith.constant 0 : index
    %121 = vector.load %arg16[%c160, %c0_87] : memref<200x256xf32, #tpu.memory_space<vmem>>, vector<8x256xf32>
    tpu.vector_store %arg16[%c160, %c0_87], %120 {strides = array<i32>} : memref<200x256xf32, #tpu.memory_space<vmem>>, vector<8x256xf32>,
    %122 = vector.extract_strided_slice %38 {offsets = [0, 79], sizes = [8, 256], strides = [1, 1]} : vector<8x352xf32> to vector<8x256xf32>
    %c168 = arith.constant 168 : index
    %c0_88 = arith.constant 0 : index
    %123 = vector.load %arg16[%c168, %c0_88] : memref<200x256xf32, #tpu.memory_space<vmem>>, vector<8x256xf32>
    tpu.vector_store %arg16[%c168, %c0_88], %122 {strides = array<i32>} : memref<200x256xf32, #tpu.memory_space<vmem>>, vector<8x256xf32>,
    %124 = vector.extract_strided_slice %42 {offsets = [0, 80], sizes = [8, 256], strides = [1, 1]} : vector<8x352xf32> to vector<8x256xf32>
    %c176 = arith.constant 176 : index
    %c0_89 = arith.constant 0 : index
    %125 = vector.load %arg16[%c176, %c0_89] : memref<200x256xf32, #tpu.memory_space<vmem>>, vector<8x256xf32>
    tpu.vector_store %arg16[%c176, %c0_89], %124 {strides = array<i32>} : memref<200x256xf32, #tpu.memory_space<vmem>>, vector<8x256xf32>,
    %126 = vector.extract_strided_slice %46 {offsets = [0, 81], sizes = [8, 256], strides = [1, 1]} : vector<8x352xf32> to vector<8x256xf32>
    %c184 = arith.constant 184 : index
    %c0_90 = arith.constant 0 : index
    %127 = vector.load %arg16[%c184, %c0_90] : memref<200x256xf32, #tpu.memory_space<vmem>>, vector<8x256xf32>
    tpu.vector_store %arg16[%c184, %c0_90], %126 {strides = array<i32>} : memref<200x256xf32, #tpu.memory_space<vmem>>, vector<8x256xf32>,
    %128 = vector.extract_strided_slice %50 {offsets = [0, 82], sizes = [8, 256], strides = [1, 1]} : vector<8x352xf32> to vector<8x256xf32>
    %c192 = arith.constant 192 : index
    %c0_91 = arith.constant 0 : index
    %129 = vector.load %arg16[%c192, %c0_91] : memref<200x256xf32, #tpu.memory_space<vmem>>, vector<8x256xf32>
    tpu.vector_store %arg16[%c192, %c0_91], %128 {strides = array<i32>} : memref<200x256xf32, #tpu.memory_space<vmem>>, vector<8x256xf32>,
    %c0_92 = arith.constant 0 : index
    %c0_93 = arith.constant 0 : index
    %130 = vector.load %arg6[%c0_92, %c0_93] : memref<8x200xf32, #tpu.memory_space<vmem>>, vector<8x200xf32>
    %c0_94 = arith.constant 0 : index
    %c0_95 = arith.constant 0 : index
    %131 = vector.load %arg16[%c0_94, %c0_95] : memref<200x256xf32, #tpu.memory_space<vmem>>, vector<200x256xf32>
    %cst_96 = arith.constant dense<0.000000e+00> : vector<8x256xf32>
    %132 = tpu.matmul %130, %131, %cst_96 {dimension_numbers = #tpu.dot_dimension_numbers<[1], [0], [0], [1], [0, 0, 1, 1], [], []>} : vector<8x200xf32>, vector<200x256xf32>, vector<8x256xf32> -> vector<8x256xf32>
    %c0_97 = arith.constant 0 : index
    %c0_98 = arith.constant 0 : index
    %133 = vector.load %arg7[%c0_97, %c0_98] : memref<8x256xf32, #tpu.memory_space<vmem>>, vector<8x256xf32>
    %134 = arith.addf %132, %133 : vector<8x256xf32>
    %cst_99 = arith.constant 0.000000e+00 : f32
    %135 = vector.broadcast %cst_99 : f32 to vector<8x256xf32>
    %136 = arith.maximumf %134, %135 : vector<8x256xf32>
    %c0_100 = arith.constant 0 : index
    %c16_101 = arith.constant 16 : index
    %c0_102 = arith.constant 0 : index
    %137 = vector.load %arg13[%c0_100, %c16_101, %c0_102] : memref<1x32x256xf32, #tpu.memory_space<vmem>>, vector<1x8x256xf32>
    %138 = vector.shape_cast %137 : vector<1x8x256xf32> to vector<8x256xf32>
    %139 = vector.shape_cast %136 : vector<8x256xf32> to vector<1x8x256xf32>
    tpu.vector_store %arg13[%c0_100, %c16_101, %c0_102], %139 {strides = array<i32>} : memref<1x32x256xf32, #tpu.memory_space<vmem>>, vector<1x8x256xf32>,
    %140 = vector.extract_strided_slice %5 {offsets = [0, 31], sizes = [4, 256], strides = [1, 1]} : vector<4x352xf32> to vector<4x256xf32>
    %141 = vector.extract_strided_slice %5 {offsets = [0, 32], sizes = [4, 256], strides = [1, 1]} : vector<4x352xf32> to vector<4x256xf32>
    %142 = vector.extract_strided_slice %5 {offsets = [0, 33], sizes = [4, 256], strides = [1, 1]} : vector<4x352xf32> to vector<4x256xf32>
    %143 = vector.extract_strided_slice %5 {offsets = [0, 47], sizes = [4, 256], strides = [1, 1]} : vector<4x352xf32> to vector<4x256xf32>
    %144 = vector.extract_strided_slice %5 {offsets = [0, 48], sizes = [4, 256], strides = [1, 1]} : vector<4x352xf32> to vector<4x256xf32>
    %145 = vector.extract_strided_slice %5 {offsets = [0, 49], sizes = [4, 256], strides = [1, 1]} : vector<4x352xf32> to vector<4x256xf32>
    %146 = vector.extract_strided_slice %5 {offsets = [0, 63], sizes = [4, 256], strides = [1, 1]} : vector<4x352xf32> to vector<4x256xf32>
    %147 = vector.extract_strided_slice %5 {offsets = [0, 64], sizes = [4, 256], strides = [1, 1]} : vector<4x352xf32> to vector<4x256xf32>
    %148 = vector.extract_strided_slice %5 {offsets = [0, 65], sizes = [4, 256], strides = [1, 1]} : vector<4x352xf32> to vector<4x256xf32>
    %149 = arith.maximumf %140, %141 : vector<4x256xf32>
    %150 = arith.maximumf %142, %143 : vector<4x256xf32>
    %151 = arith.maximumf %144, %145 : vector<4x256xf32>
    %152 = arith.maximumf %146, %147 : vector<4x256xf32>
    %153 = arith.maximumf %149, %150 : vector<4x256xf32>
    %154 = arith.maximumf %151, %152 : vector<4x256xf32>
    %155 = arith.maximumf %153, %154 : vector<4x256xf32>
    %156 = arith.maximumf %155, %148 : vector<4x256xf32>
    %c0_103 = arith.constant 0 : index
    %c0_104 = arith.constant 0 : index
    %157 = vector.load %arg12[%c0_103, %c0_104] : memref<1x256xf32, #tpu.memory_space<vmem>>, vector<1x256xf32>
    %158 = vector.broadcast %157 : vector<1x256xf32> to vector<4x256xf32>
    %159 = arith.mulf %156, %158 : vector<4x256xf32>
    %c0_105 = arith.constant 0 : index
    %c0_106 = arith.constant 0 : index
    %160 = vector.load %arg8[%c0_105, %c0_106] : memref<8x4xf32, #tpu.memory_space<vmem>>, vector<8x4xf32>
    %cst_107 = arith.constant dense<0.000000e+00> : vector<8x256xf32>
    %161 = tpu.matmul %160, %159, %cst_107 {dimension_numbers = #tpu.dot_dimension_numbers<[1], [0], [0], [1], [0, 0, 1, 1], [], []>} : vector<8x4xf32>, vector<4x256xf32>, vector<8x256xf32> -> vector<8x256xf32>
    %c0_108 = arith.constant 0 : index
    %c0_109 = arith.constant 0 : index
    %162 = vector.load %arg9[%c0_108, %c0_109] : memref<8x1xf32, #tpu.memory_space<vmem>>, vector<8x1xf32>
    %163 = vector.broadcast %162 : vector<8x1xf32> to vector<8x256xf32>
    %164 = arith.addf %161, %163 : vector<8x256xf32>
    %cst_110 = arith.constant 0.000000e+00 : f32
    %165 = vector.broadcast %cst_110 : f32 to vector<8x256xf32>
    %166 = arith.maximumf %164, %165 : vector<8x256xf32>
    %c0_111 = arith.constant 0 : index
    %c24_112 = arith.constant 24 : index
    %c0_113 = arith.constant 0 : index
    %167 = vector.load %arg13[%c0_111, %c24_112, %c0_113] : memref<1x32x256xf32, #tpu.memory_space<vmem>>, vector<1x8x256xf32>
    %168 = vector.shape_cast %167 : vector<1x8x256xf32> to vector<8x256xf32>
    %169 = vector.shape_cast %166 : vector<8x256xf32> to vector<1x8x256xf32>
    tpu.vector_store %arg13[%c0_111, %c24_112, %c0_113], %169 {strides = array<i32>} : memref<1x32x256xf32, #tpu.memory_space<vmem>>, vector<1x8x256xf32>,
    return
  }
  func.func @transform_0(%arg0: i32) -> (i32, i32, i32) {
    %c0_i32 = arith.constant 0 : i32
    %c0_i32_0 = arith.constant 0 : i32
    %c0_i32_1 = arith.constant 0 : i32
    return %arg0, %c0_i32, %c0_i32_0 : i32, i32, i32
  }
  func.func @transform_1(%arg0: i32) -> (i32, i32) {
    %c0_i32 = arith.constant 0 : i32
    %c0_i32_0 = arith.constant 0 : i32
    %c0_i32_1 = arith.constant 0 : i32
    return %c0_i32, %c0_i32_0 : i32, i32
  }
  func.func @transform_2(%arg0: i32) -> (i32, i32) {
    %c0_i32 = arith.constant 0 : i32
    %c0_i32_0 = arith.constant 0 : i32
    %c0_i32_1 = arith.constant 0 : i32
    return %c0_i32, %c0_i32_0 : i32, i32
  }
  func.func @transform_3(%arg0: i32) -> (i32, i32) {
    %c0_i32 = arith.constant 0 : i32
    %c0_i32_0 = arith.constant 0 : i32
    %c0_i32_1 = arith.constant 0 : i32
    return %c0_i32, %c0_i32_0 : i32, i32
  }
  func.func @transform_4(%arg0: i32) -> (i32, i32) {
    %c0_i32 = arith.constant 0 : i32
    %c0_i32_0 = arith.constant 0 : i32
    %c0_i32_1 = arith.constant 0 : i32
    return %c0_i32, %c0_i32_0 : i32, i32
  }
  func.func @transform_5(%arg0: i32) -> (i32, i32) {
    %c0_i32 = arith.constant 0 : i32
    %c0_i32_0 = arith.constant 0 : i32
    %c0_i32_1 = arith.constant 0 : i32
    return %c0_i32, %c0_i32_0 : i32, i32
  }
  func.func @transform_6(%arg0: i32) -> (i32, i32) {
    %c0_i32 = arith.constant 0 : i32
    %c0_i32_0 = arith.constant 0 : i32
    %c0_i32_1 = arith.constant 0 : i32
    return %c0_i32, %c0_i32_0 : i32, i32
  }
  func.func @transform_7(%arg0: i32) -> (i32, i32) {
    %c0_i32 = arith.constant 0 : i32
    %c0_i32_0 = arith.constant 0 : i32
    %c0_i32_1 = arith.constant 0 : i32
    return %c0_i32, %c0_i32_0 : i32, i32
  }
  func.func @transform_8(%arg0: i32) -> (i32, i32) {
    %c0_i32 = arith.constant 0 : i32
    %c0_i32_0 = arith.constant 0 : i32
    %c0_i32_1 = arith.constant 0 : i32
    return %c0_i32, %c0_i32_0 : i32, i32
  }
  func.func @transform_9(%arg0: i32) -> (i32, i32, i32) {
    %c0_i32 = arith.constant 0 : i32
    %c0_i32_0 = arith.constant 0 : i32
    %c0_i32_1 = arith.constant 0 : i32
    %c0_i32_2 = arith.constant 0 : i32
    return %c0_i32, %c0_i32_0, %c0_i32_1 : i32, i32, i32
  }
  func.func @transform_10(%arg0: i32) -> (i32, i32, i32) {
    %c0_i32 = arith.constant 0 : i32
    %c0_i32_0 = arith.constant 0 : i32
    %c0_i32_1 = arith.constant 0 : i32
    %c0_i32_2 = arith.constant 0 : i32
    return %c0_i32, %c0_i32_0, %c0_i32_1 : i32, i32, i32
  }
  func.func @transform_11(%arg0: i32) -> (i32, i32) {
    %c0_i32 = arith.constant 0 : i32
    %c0_i32_0 = arith.constant 0 : i32
    %c0_i32_1 = arith.constant 0 : i32
    return %c0_i32, %c0_i32_0 : i32, i32
  }
  func.func @transform_12(%arg0: i32) -> (i32, i32, i32) {
    %c0_i32 = arith.constant 0 : i32
    %c0_i32_0 = arith.constant 0 : i32
    %c0_i32_1 = arith.constant 0 : i32
    return %arg0, %c0_i32, %c0_i32_0 : i32, i32, i32
  }
}

</mosaic_0001>

<bundles_post_ra>
// kernel: inception_forward.1
= control target key start
LH: loop header
LB: loop body
LE: loop exit
PB: predicated region body
PF: predicated region fallthrough
CT: control target
= control target key end

     0   :  { %s2233_s21 = smov 0   ;;  %s2846_s0 = inlined_call_operand.vmem [shape: f32[2,4,256], index: 0, kind: input, shape index: {}]   ;;  %s2847_s1 = inlined_call_operand.vmem [shape: f32[24,4], index: 1, kind: input, shape index: {}]   ;;  %s2848_s2 = inlined_call_operand.vmem [shape: f32[24,1], index: 2, kind: input, shape index: {}]   ;;  %s2849_s3 = inlined_call_operand.vmem [shape: f32[8,72], index: 3, kind: input, shape index: {}]   ;;  %s2850_s4 = inlined_call_operand.vmem [shape: f32[8,1], index: 4, kind: input, shape index: {}]   ;;  %s2851_s5 = inlined_call_operand.vmem [shape: f32[8,200], index: 5, kind: input, shape index: {}]   ;;  %s2852_s6 = inlined_call_operand.vmem [shape: f32[8,256], index: 6, kind: input, shape index: {}]   ;;  %s2853_s7 = inlined_call_operand.vmem [shape: f32[8,4], index: 7, kind: input, shape index: {}]   ;;  %s2854_s8 = inlined_call_operand.vmem [shape: f32[8,1], index: 8, kind: input, shape index: {}]   ;;  %s2855_s9 = inlined_call_operand.vmem [shape: f32[3,1,352], index: 9, kind: input, shape index: {}]   ;;  %s2856_s10 = inlined_call_operand.vmem [shape: f32[5,1,352], index: 10, kind: input, shape index: {}]   ;;  %s2857_s11 = inlined_call_operand.vmem [shape: f32[1,256], index: 11, kind: input, shape index: {}]   ;;  %s2858_s12 = inlined_call_operand.vmem [shape: f32[2,32,256], index: 12, kind: output, shape index: {}]  }
   0x1 LB: > { %s1775_s22 = sadd.s32 4294967295, %s2135_s21   ;;  %p1779_p0 = scmp.ge.s32.totalorder %s2135_s21, 1  ;;  %s2135_s21 = sphi %s2233_s21, %s22_s21  }
   0x2   : > { %p362_p1 = scmp.lt.s32.totalorder %s2135_s21, 3 }
   0x4   : > { %p363_p2 = pnand %p1779_p0, %p362_p1 }
   0x5   : > { %p404_p3 = scmp.lt.s32.totalorder (!%p363_p2), %s1775_s22, 1  ;;  %vm415_vm0 = vcmask (!%p363_p2), 781312   ;;  %v2137_v0 = vmov (!%p363_p2), 0.0   ;;  %v2138_v2 = vmov (!%p363_p2), 0   ;;  %s2868_s27 = smov (!%p363_p2), 48   ;;  %vm426_vm1 = vcmask (!%p363_p2), 1043840  }
   0x6   : > { %366 = sbr.rel (%p363_p2) target bundleno = 895 (0x37f), region = 68  ;;  %414 = vst [vmem:[#allocation2] sm:$0xff] (!%p363_p2), %v2137_v0  ;;  %416 = vst.msk [vmem:[#allocation2 + $0x8] sm:$0xf] (!%p363_p2), %vm415_vm0, %v2137_v0  ;;  %539 = vmatprep.mubr.f32.mxu0 (!%p363_p2), %v2137_v0  ;;  %1926 = vset.pattern.permute.xlu1 (!%p363_p2), %v2138_v2  ;;  %vm427_vm2 = vcmask (!%p363_p2), 1047556   ;;  %vm422_vm3 = vcmask (!%p363_p2), 392192   ;;  %v665_v14 = vlaneseq (!%p363_p2) }
   0x7   : > { %1927 = vset.pattern.permute.xlu0 (!%p363_p2), %v2138_v2  ;;  %vm430_vm4 = vcmask (!%p363_p2), 388096   ;;  %vm428_vm5 = vmor (!%p363_p2), %vm427_vm2, %vm426_vm1  ;;  %s2140_s28 = smov (!%p363_p2), 127   ;;  %vm2872_vm6 = vcmask (!%p363_p2), 1043456   ;;  %v439_v9 = vld [vmem:[%s2848_s2 + $0x10] sm:$0xff] (!%p363_p2)  ;;  %v434_v10 = vld [vmem:[%s2847_s1] sm:$0xff] (!%p363_p2)  ;;  %vm2871_vm7 = vcmask (!%p363_p2), 31744  }
   0x8   : > { %s2141_s15 = smov (!%p363_p2), 114   ;;  %v438_v11 = vld [vmem:[%s2848_s2 + $0x8] sm:$0xff] (!%p363_p2)  ;;  %s2859_s20 = smov (!%p363_p2), 94   ;;  %v436_v13 = vld [vmem:[%s2847_s1 + $0x10] sm:$0xff] (!%p363_p2)  ;;  %vm2143_vm8 = vmmov (!%p363_p2), 0   ;;  %v666_v15 = vshrl.u32 (!%p363_p2), %v665_v14, 7 }
   0x9   : > { %v435_v12 = vld [vmem:[%s2847_s1 + $0x8] sm:$0xff] (!%p363_p2)  ;;  %v2306_v17 = vld [vmem:[%s2856_s10] sm:$0x7] (!%p363_p2)  ;;  %v2311_v18 = vld [vmem:[%s2856_s10 + $0x3] sm:$0x7] (!%p363_p2)  ;;  %s2144_s24 = smov (!%p363_p2), 113  }
   0xa   : > { %v2301_v16 = vsub.s32 (!%p363_p2), 1, %v666_v15  ;;  %v2316_v19 = vld [vmem:[%s2856_s10 + $0x6] sm:$0x7] (!%p363_p2)  ;;  %v2323_v21 = vld [vmem:[%s2856_s10 + $0x9] sm:$0x7] (!%p363_p2)  ;;  %v2338_v27 = vsub.s32 (!%p363_p2), 0, %v666_v15 }
   0xb   : > { %v2328_v22 = vld [vmem:[%s2856_s10 + $0xc] sm:$0x7] (!%p363_p2)  ;;  %v1600_v28 = vld [vmem:[%s2857_s11] sm:$0x3] (!%p363_p2)  ;;  %v2343_v29 = vsub.s32 (!%p363_p2), 2, %v666_v15  ;;  %vm1527_vm9 = vcmask (!%p363_p2), 1039360  }
   0xc   : > { %v734_v20 = vrot.slane (!%p363_p2), %v2306_v17, %v2301_v16  ;;  %v755_v23 = vrot.slane (!%p363_p2), %v2311_v18, %v2301_v16  ;;  %v776_v24 = vrot.slane (!%p363_p2), %v2316_v19, %v2301_v16  ;;  %v797_v25 = vrot.slane (!%p363_p2), %v2323_v21, %v2301_v16  ;;  %s2145_s25 = smov (!%p363_p2), 31   ;;  %v2383_v58 = vld [vmem:[%s2855_s9] sm:$0x7] (!%p363_p2)  ;;  %v2388_v59 = vld [vmem:[%s2855_s9 + $0x3] sm:$0x7] (!%p363_p2)  ;;  %s2147_s17 = smov (!%p363_p2), 111  }
   0xd   : > { %s2889_s22 = smov (!%p404_p3, %s1775_s22), 1  ;;  %v818_v26 = vrot.slane %v2328_v22, %v2301_v16  ;;  %v738_v30 = vrot.slane %v2306_v17, %v2343_v29  ;;  %v759_v31 = vrot.slane %v2311_v18, %v2343_v29  ;;  %v780_v32 = vrot.slane %v2316_v19, %v2343_v29  ;;  %v2393_v60 = vld [vmem:[%s2855_s9 + $0x6] sm:$0x7]  ;;  %s2863_s18 = smov 112  }
   0xe   : > { %s1806_s23 = sshll.u32 %s2889_s22, 3  ;;  %v801_v33 = vrot.slane %v2323_v21, %v2343_v29  ;;  %v1605_v34 = vrot.slane %v1600_v28, %v2338_v27  ;;  %v1609_v35 = vrot.slane %v1600_v28, %v2301_v16  ;;  %v822_v36 = vrot.slane %v2328_v22, %v2343_v29  ;;  %s2861_s19 = smov 98  }
   0xf   : > { %s408_s26 = scalar_lea.vmem %s2846_s0, %s1806_s23  ;;  %vm1067_vm10 = vcmask 932864   ;;  %v689_v2 = vrot.slane %v2388_v59, %v2338_v27  ;;  %v793_v14 = vrot.slane %v2323_v21, %v2338_v27  ;;  %v772_v15 = vrot.slane %v2316_v19, %v2338_v27  ;;  %s2860_s23 = smov 110  }
  0x10   : > { %v417_v1 = vld [vmem:[%s408_s26] sm:$0xff]  ;;  %v1610_v42 = vcombine.low %v1605_v34, %v1609_v35  ;;  %s2146_s26 = smov 126   ;;  %s2154_s29 = smov 81   ;;  %vm1083_vm11 = vcmask 924672   ;;  %vm1554_vm12 = vcmask 1031168   ;;  %vm854_vm13 = vcmask 785408  }
  0x11   : > { %419 = vrot.lane.b32.xlu0 %v417_v1, %s2868_s27  ;;  %v668_v1 = vrot.slane %v2383_v58, %v2338_v27  ;;  %s2862_s30 = smov 82   ;;  %s2156_s13 = smov 79   ;;  %vm883_vm14 = vcmask 662528   ;;  %vm838_vm15 = vcmask 793600   ;;  %vm908_vm0 = vcmask 646144  }
  0x12   : > { %s2157_s14 = smov 80   ;;  %s2158_s16 = smov 66   ;;  %vm1193_vm1 = vcmask 769024   ;;  %vm934_vm2 = vcmask 523264  }
  0x83   : > { %v420_v3 = vpop.permute.xlu0 %419 }
  0x84   : > { %v421_v4 = vrot.slane %v420_v3, 4 }
  0x86   : > { %v423_v5 = vsel %vm422_vm3, %v421_v4, %v420_v3  ;;  %431 = vst.msk [vmem:[#allocation2 + $0x8] sm:$0xf] %vm430_vm4, %v421_v4  ;;  %v710_v3 = vrot.slane %v2393_v60, %v2338_v27  ;;  %vm870_vm4 = vcmask 777216  }
  0x87   : > { %429 = vst.msk [vmem:[#allocation2] sm:$0xff] %vm428_vm5, %v423_v5  ;;  %vm1115_vm5 = vcmask 908288  }
  0x8d   : > { %v2252_v6 = vld [vmem:[#allocation2 + $0x8] sm:$0xf] }
  0x8e   : > { %1522 = vrot.lane.b32.xlu1 %v2252_v6, %s2140_s28  ;;  %v2255_v7 = vld [vmem:[#allocation2] sm:$0xff] }
  0x8f   : > { %1520 = vrot.lane.b32.xlu0 %v2255_v7, %s2140_s28  ;;  %v457_v8 = vcombine.high %v2255_v7, %v2255_v7  ;;  %s2153_s28 = smov 95  }
  0x91   : > { %1784 = vmatprep.subr.msk.mxu0 %vm2872_vm6, %v457_v8  ;;  %v714_v8 = vrot.slane %v2393_v60, %v2301_v16 }
  0x92   : > { %452 = vperm.xlu1 %1926, %v439_v9   ;;  %1785 = vmatpush1.msk.msra.mxu0 %vm2872_vm6, %v2255_v7 }
  0x93   : > { %1535 = vrot.lane.b32.xlu0 %v2252_v6, %s2141_s15  ;;  %1786 = vmatmul.mubr.msk.f32.vlgmr.msra.gmra.mrb[0].mxu0 %vm2871_vm7, %v434_v10 }
  0x94   : > { %1812 = vmatprep.subr.mxu0 %v2137_v0  ;;  %545 = vmatprep.mubr.f32.mxu0 %v2137_v0 }
  0x95   : > { %1813 = vmatpush3.msk.msra.mxu0 %vm2872_vm6, %v2252_v6 }
  0x96   : > { %1590 = vrot.lane.b32.xlu1 %v2252_v6, %s2859_s20 }
  0x97   : > { %447 = vperm.xlu0 %1927, %v438_v11   ;;  %1787 = vmatmul.mubr.msk.f32.gmra.mrb[2].mxu0 %vm2871_vm7, %v435_v12 }
  0x98   : > { %551 = vmatprep.mubr.f32.mxu0 %v2137_v0 }
  0x9a   : > { %1533 = vrot.lane.b32.xlu1 %v2255_v7, %s2141_s15 }
  0x9b   : > { %1588 = vrot.lane.b32.xlu0 %v2255_v7, %s2859_s20  ;;  %1788 = vmatmul.mubr.msk.f32.gmra.mrb[4].mxu0 %vm2871_vm7, %v436_v13 }
  0x9c   : > { %1814 = vmatprep.mubr.msk.f32.mxu0 %vm2143_vm8, %v2137_v0 }
  0x9f   : > { %1815 = vmatmul.mubr.msk.f32.vlgmr.msra.gmra.mrb[6].mxu0 %vm2871_vm7, %v434_v10  ;;  %v751_v10 = vrot.slane %v2311_v18, %v2338_v27 }
  0xa0   : > { %1817 = vmatprep.mubr.msk.f32.mxu0 %vm2143_vm8, %v2137_v0 }
  0xa3   : > { %1818 = vmatmul.mubr.msk.f32.gmra.mrb[8].mxu0 %vm2871_vm7, %v435_v12 }
  0xa4   : > { %1820 = vmatprep.mubr.msk.f32.mxu0 %vm2143_vm8, %v2137_v0  ;;  %vm1614_vm8 = vcmask 252928  }
  0xa7   : > { %1821 = vmatmul.mubr.msk.f32.gmra.mrb[10].mxu0 %vm2871_vm7, %v436_v13  ;;  %v730_v13 = vrot.slane %v2306_v17, %v2338_v27  ;;  %vm979_vm7 = vcmask 588800  }
  0xa8   : > { %1047 = vmatprep.mubr.f32.mxu0 %v2137_v0 }
 0x100   : > { %v1523_v37 = vpop.permute.xlu1 %1522 }
 0x101   : > { %v1525_v38 = vrot.slane %v1523_v37, 4  ;;  %v2358_v39 = vmax.f32 %v2252_v6, %v1523_v37  ;;  %v1521_v40 = vpop.permute.xlu0 %1520 }
 0x102   : > { %v1524_v41 = vrot.slane %v1521_v40, 4 }
 0x103   : > { %1564 = vrot.lane.b32.xlu0 %v2358_v39, %s2144_s24 }
 0x104   : > { %v1526_v43 = vsel %vm2872_vm6, %v1524_v41, %v1525_v38 }
 0x105   : > { %v1536_v44 = vpop.permute.xlu0 %1535  ;;  %v1528_v46 = vsel %vm1527_vm9, %v1521_v40, %v1526_v43  ;;  %vm656_vm9 = vcmask 654336  }
 0x106   : > { %v1544_v45 = vmax.f32 %v2252_v6, %v1536_v44  ;;  %v2365_v47 = vmax.f32 %v2255_v7, %v1528_v46  ;;  %v1538_v51 = vrot.slane %v1536_v44, 4  ;;  %v672_v6 = vrot.slane %v2383_v58, %v2301_v16 }
 0x107   : > { %1611 = vrot.lane.b32.xlu0 %v1610_v42, %s2145_s25  ;;  %s2151_s25 = smov 96  }
 0x108   : > { %1549 = vrot.lane.b32.xlu1 %v1544_v45, %s2146_s26  ;;  %v814_v45 = vrot.slane %v2328_v22, %v2338_v27 }
 0x10c   : > { %1562 = vrot.lane.b32.xlu1 %v2365_v47, %s2144_s24 }
 0x111   : > { %v2369_v48 = vpop.permute.xlu1 %452 }
 0x115   : > { %v2371_v49 = vpop.permute.xlu1 %1590 }
 0x116   : > { %v448_v61 = vpop.permute.xlu0 %447 }
 0x119   : > { %v1534_v50 = vpop.permute.xlu1 %1533 }
 0x11a   : > { %v1537_v52 = vrot.slane %v1534_v50, 4  ;;  %v2526_v22 = vpop.permute.xlu0 %1588 }
 0x11c   : > { %v1539_v53 = vsel %vm2872_vm6, %v1537_v52, %v1538_v51  ;;  %v676_v51 = vrot.slane %v2383_v58, %v2343_v29 }
 0x11d   : > { %v1540_v54 = vsel %vm1067_vm10, %v1534_v50, %v1539_v53 }
 0x11e   : > { %v1543_v55 = vmax.f32 %v2255_v7, %v1540_v54  ;;  %v693_v7 = vrot.slane %v2388_v59, %v2301_v16 }
 0x120   : > { %1547 = vrot.lane.b32.xlu1 %v1543_v55, %s2146_s26  ;;  %s2152_s26 = smov 97  }
 0x166   : > { %v2376_v56 = vpop.f32.mrb[0].mxu0 }
 0x167   : > { %v2378_v57 = vpop.f32.mrb[1].mxu0 }
 0x16a   : > { %v547_v62 = vpop.f32.mrb[2].mxu0 }
 0x16b   : > { %v548_v63 = vadd.f32 %v547_v62, %v448_v61  ;;  %v549_v4 = vpop.f32.mrb[3].mxu0 }
 0x16c   : > { %v550_v5 = vadd.f32 %v549_v4, %v448_v61  ;;  %v718_v4 = vrot.slane %v2393_v60, %v2343_v29 }
 0x16d   : > { %v641_v9 = vmax.f32 %v548_v63, 0.0 }
 0x16e   : > { %v642_v11 = vmax.f32 %v550_v5, 0.0  ;;  %v553_v12 = vpop.f32.mrb[4].mxu0 }
 0x16f   : > { %v680_v28 = vmul.f32 %v668_v1, %v641_v9  ;;  %v701_v34 = vmul.f32 %v689_v2, %v641_v9  ;;  %v2415_v35 = vmul.f32 %v710_v3, %v641_v9  ;;  %v554_v37 = vadd.f32 %v553_v12, %v2369_v48  ;;  %v555_v38 = vpop.f32.mrb[5].mxu0 }
 0x170   : > { %v681_v40 = vmul.f32 %v672_v6, %v642_v11  ;;  %v702_v41 = vmul.f32 %v693_v7, %v642_v11  ;;  %v2418_v42 = vmul.f32 %v714_v8, %v642_v11  ;;  %v556_v43 = vadd.f32 %v555_v38, %v2369_v48 }
 0x171   : > { %v644_v44 = vmax.f32 %v554_v37, 0.0 }
 0x172   : > { %v645_v46 = vmax.f32 %v556_v43, 0.0  ;;  %v2423_v50 = vpop.f32.mrb[6].mxu0 }
 0x173   : > { %v1816_v52 = vpop.f32.mrb[7].mxu0  ;;  %v2427_v53 = vmul.f32 %v751_v10, %v644_v44  ;;  %v2429_v54 = vmul.f32 %v730_v13, %v644_v44  ;;  %v2431_v55 = vmul.f32 %v793_v14, %v644_v44  ;;  %v2433_v62 = vmul.f32 %v772_v15, %v644_v44 }
 0x174   : > { %v743_v63 = vmul.f32 %v734_v20, %v645_v46  ;;  %v764_v27 = vmul.f32 %v755_v23, %v645_v46  ;;  %v785_v58 = vmul.f32 %v776_v24, %v645_v46  ;;  %v806_v1 = vmul.f32 %v797_v25, %v645_v46 }
 0x175   : > { %1077 = vrot.lane.b32.xlu0 %v2427_v53, %s2144_s24  ;;  %1061 = vrot.lane.b32.xlu1 %v2429_v54, %s2141_s15  ;;  %v2451_v2 = vmul.f32 %v814_v45, %v644_v44  ;;  %v1933_v20 = vpack.i.bf16 %v702_v41, %v2433_v62  ;;  %v1928_v23 = vpack.i.bf16 %v681_v40, %v2427_v53 }
 0x176   : > { %v629_v3 = vpop.f32.mrb[8].mxu0  ;;  %v697_v24 = vrot.slane %v2388_v59, %v2343_v29  ;;  %v1938_v25 = vpack.i.bf16 %v2418_v42, %v2431_v55  ;;  %v2464_v7 = vmul.f32 %v818_v26, %v645_v46 }
 0x177   : > { %v630_v5 = vadd.f32 %v629_v3, %v448_v61  ;;  %v1819_v6 = vpop.f32.mrb[9].mxu0 }
 0x179   : > { %v643_v8 = vmax.f32 %v630_v5, 0.0  ;;  %1109 = vrot.lane.b32.xlu0 %v2431_v55, %s2147_s17  ;;  %1093 = vrot.lane.b32.xlu1 %v2433_v62, %s2863_s18  ;;  %s2163_s18 = smov 63  }
 0x17a   : > { %v634_v59 = vpop.f32.mrb[10].mxu0  ;;  %v2528_v29 = vpop.permute.xlu1 %1549 }
 0x17b   : > { %v682_v60 = vmul.f32 %v676_v51, %v643_v8  ;;  %v703_v9 = vmul.f32 %v697_v24, %v643_v8  ;;  %v2470_v10 = vmul.f32 %v718_v4, %v643_v8  ;;  %v1822_v61 = vpop.f32.mrb[11].mxu0  ;;  %v635_v11 = vadd.f32 %v634_v59, %v2369_v48 }
 0x17c   : > { %v1552_v8 = vrot.slane %v2528_v29, 4  ;;  %v1592_v59 = vrot.slane %v2526_v22, 4 }
 0x17d   : > { %1138 = vrot.lane.b32.xlu0 %v2429_v54, %s2861_s19  ;;  %1125 = vrot.lane.b32.xlu1 %v2451_v2, %s2860_s23  ;;  %v1973_v16 = vpack.i.bf16 %v701_v34, %v703_v9  ;;  %v2477_v26 = vpack.i.bf16 %v680_v28, %v682_v60  ;;  %v1993_v12 = vpack.i.bf16 %v2415_v35, %v2470_v10  ;;  %v646_v13 = vmax.f32 %v635_v11, 0.0  ;;  %s2867_s23 = smov 64   ;;  %s2161_s19 = smov 65  }
 0x17e   : > { %v1559_v60 = vmax.f32 %v2358_v39, %v2528_v29  ;;  %v1593_v11 = vrot.slane %v2371_v49, 4 }
 0x17f   : > { %v744_v14 = vmul.f32 %v738_v30, %v646_v13  ;;  %v765_v48 = vmul.f32 %v759_v31, %v646_v13  ;;  %v786_v15 = vmul.f32 %v780_v32, %v646_v13  ;;  %v807_v28 = vmul.f32 %v801_v33, %v646_v13  ;;  %v1565_v31 = vpop.permute.xlu0 %1564  ;;  %v1563_v32 = vpop.permute.xlu1 %1562 }
 0x180   : > { %v2496_v34 = vmul.f32 %v822_v36, %v646_v13  ;;  %v1573_v33 = vmax.f32 %v2358_v39, %v1565_v31  ;;  %v1566_v36 = vrot.slane %v1563_v32, 4  ;;  %v1567_v37 = vrot.slane %v1565_v31, 4 }
 0x181   : > { %1934 = vrot.lane.b32.xlu0 %v1933_v20, %s2151_s25  ;;  %1929 = vrot.lane.b32.xlu1 %v1928_v23, %s2152_s26  ;;  %v2500_v17 = vpack.i.bf16 %v765_v48, %v764_v27  ;;  %v2502_v18 = vpack.i.bf16 %v744_v14, %v743_v63  ;;  %v2504_v19 = vpack.i.bf16 %v807_v28, %v806_v1 }
 0x182   : > { %v2506_v30 = vpack.i.bf16 %v786_v15, %v785_v58  ;;  %v2510_v21 = vpack.i.bf16 %v2496_v34, %v2464_v7  ;;  %v1568_v38 = vsel %vm2872_vm6, %v1566_v36, %v1567_v37  ;;  %v2671_v13 = vsel %vm2872_vm6, %v1592_v59, %v1593_v11 }
 0x183   : > { %v1569_v40 = vsel %vm1083_vm11, %v1563_v32, %v1568_v38 }
 0x184   : > { %v1572_v41 = vmax.f32 %v2365_v47, %v1569_v40 }
 0x185   : > { %1187 = vrot.lane.b32.xlu0 %v2451_v2, %s2859_s20  ;;  %1939 = vrot.lane.b32.xlu1 %v1938_v25, %s2153_s28  ;;  %s2864_s20 = smov 78  }
 0x189   : > { %1944 = vrot.lane.b32.xlu0 %v1928_v23, %s2154_s29  ;;  %1200 = vrot.lane.b32.xlu1 %v2429_v54, %s2862_s30  ;;  %s2866_s30 = smov 62  }
 0x18d   : > { %1954 = vrot.lane.b32.xlu0 %v1938_v25, %s2156_s13  ;;  %1949 = vrot.lane.b32.xlu1 %v1933_v20, %s2157_s14 }
 0x191   : > { %1262 = vrot.lane.b32.xlu0 %v2429_v54, %s2158_s16  ;;  %1249 = vrot.lane.b32.xlu1 %v2451_v2, %s2864_s20  ;;  %s2865_s20 = smov 50  }
 0x195   : > { %1964 = vrot.lane.b32.xlu0 %v1933_v20, %s2867_s23  ;;  %1959 = vrot.lane.b32.xlu1 %v1928_v23, %s2161_s19 }
 0x199   : > { %1311 = vrot.lane.b32.xlu0 %v2451_v2, %s2866_s30  ;;  %1299 = vrot.lane.b32.xlu1 %v2431_v55, %s2163_s18  ;;  %s2869_s30 = smov 47  }
 0x19d   : > { %1324 = vrot.lane.b32.xlu1 %v2429_v54, %s2865_s20  ;;  %1974 = vrot.lane.b32.xlu0 %v1973_v16, %s2151_s25  ;;  %s2870_s20 = smov 49  }
 0x1a1   : > { %1578 = vrot.lane.b32.xlu1 %v1573_v33, %s2147_s17  ;;  %1984 = vrot.lane.b32.xlu0 %v2477_v26, %s2154_s29 }
 0x1a5   : > { %1994 = vrot.lane.b32.xlu0 %v1993_v12, %s2156_s13  ;;  %1969 = vrot.lane.b32.xlu1 %v2477_v26, %s2152_s26 }
 0x1a9   : > { %2004 = vrot.lane.b32.xlu0 %v1973_v16, %s2867_s23  ;;  %1979 = vrot.lane.b32.xlu1 %v1993_v12, %s2153_s28  ;;  %s2167_s23 = smov 46  }
 0x1ad   : > { %1576 = vrot.lane.b32.xlu0 %v1572_v41, %s2147_s17  ;;  %1989 = vrot.lane.b32.xlu1 %v1973_v16, %s2157_s14 }
 0x1b1   : > { %1337 = vrot.lane.b32.xlu0 %v2427_v53, %s2870_s20  ;;  %1999 = vrot.lane.b32.xlu1 %v2477_v26, %s2161_s19  ;;  %s2875_s20 = smov 110  }
 0x1b5   : > { %1362 = vrot.lane.b32.xlu0 %v2431_v55, %s2869_s30  ;;  %1350 = vrot.lane.b32.xlu1 %v2433_v62, %s2868_s27  ;;  %s2873_s27 = smov 112   ;;  %s2874_s30 = smov 98  }
 0x1b9   : > { %945 = vrot.lane.b32.xlu0 %v2470_v10, %s2163_s18  ;;  %943 = vrot.lane.b32.xlu1 %v2418_v42, %s2163_s18  ;;  %v2603_v42 = vpop.permute.xlu0 %1611 }
 0x1ba   : > { %v1613_v48 = vrot.slane %v2603_v42, 4 }
 0x1bd   : > { %1377 = vrot.lane.b32.xlu0 %v2464_v7, %s2167_s23  ;;  %941 = vrot.lane.b32.xlu1 %v2415_v35, %s2163_s18  ;;  %v1548_v35 = vpop.permute.xlu1 %1547 }
 0x1be   : > { %v1551_v5 = vrot.slane %v1548_v35, 4 }
 0x1c0   : > { %v1553_v9 = vsel %vm2872_vm6, %v1551_v5, %v1552_v8 }
 0x1c1   : > { %2014 = vrot.lane.b32.xlu0 %v2500_v17, %s2144_s24  ;;  %2009 = vrot.lane.b32.xlu1 %v2502_v18, %s2141_s15  ;;  %s2876_s24 = smov 94   ;;  %s2878_s15 = smov 78   ;;  %v2673_v14 = vsel %vm1554_vm12, %v1548_v35, %v1553_v9  ;;  %vm921_vm12 = vcmask 531456  }
 0x1c5   : > { %2024 = vrot.lane.b32.xlu0 %v2504_v19, %s2147_s17  ;;  %2019 = vrot.lane.b32.xlu1 %v2506_v30, %s2873_s27  ;;  %s2877_s27 = smov 82   ;;  %s2880_s17 = smov 62  }
 0x1c9   : > { %2034 = vrot.lane.b32.xlu0 %v2502_v18, %s2874_s30  ;;  %2029 = vrot.lane.b32.xlu1 %v2510_v21, %s2875_s20  ;;  %s2879_s20 = smov 64  }
 0x1cd   : > { %2044 = vrot.lane.b32.xlu0 %v2506_v30, %s2151_s25  ;;  %2039 = vrot.lane.b32.xlu1 %v2500_v17, %s2152_s26  ;;  %s2881_s25 = smov 49  }
 0x1d1   : > { %2054 = vrot.lane.b32.xlu0 %v2510_v21, %s2876_s24  ;;  %2049 = vrot.lane.b32.xlu1 %v2504_v19, %s2153_s28  ;;  %s2882_s28 = smov 50  }
 0x1d5   : > { %2064 = vrot.lane.b32.xlu0 %v2500_v17, %s2154_s29  ;;  %2059 = vrot.lane.b32.xlu1 %v2502_v18, %s2877_s27  ;;  %s2884_s29 = smov 48  }
 0x1d9   : > { %2074 = vrot.lane.b32.xlu0 %v2504_v19, %s2156_s13  ;;  %2069 = vrot.lane.b32.xlu1 %v2506_v30, %s2157_s14 }
 0x1dd   : > { %2084 = vrot.lane.b32.xlu0 %v2502_v18, %s2158_s16  ;;  %2079 = vrot.lane.b32.xlu1 %v2510_v21, %s2878_s15 }
 0x1e1   : > { %2094 = vrot.lane.b32.xlu0 %v2506_v30, %s2879_s20  ;;  %2089 = vrot.lane.b32.xlu1 %v2500_v17, %s2161_s19  ;;  %s2883_s19 = smov 47  }
 0x1e5   : > { %2104 = vrot.lane.b32.xlu0 %v2510_v21, %s2880_s17  ;;  %2099 = vrot.lane.b32.xlu1 %v2504_v19, %s2163_s18 }
 0x1e7   : > { %v2609_v43 = vpop.permute.xlu0 %1077  ;;  %v2611_v44 = vpop.permute.xlu1 %1061 }
 0x1e9   : > { %2114 = vrot.lane.b32.xlu0 %v2500_v17, %s2881_s25  ;;  %2109 = vrot.lane.b32.xlu1 %v2502_v18, %s2882_s28 }
 0x1eb   : > { %v2617_v45 = vpop.permute.xlu0 %1109  ;;  %v2619_v46 = vpop.permute.xlu1 %1093 }
 0x1ed   : > { %2124 = vrot.lane.b32.xlu0 %v2504_v19, %s2883_s19  ;;  %2119 = vrot.lane.b32.xlu1 %v2506_v30, %s2884_s29  ;;  %v1558_v30 = vmax.f32 %v2365_v47, %v2673_v14  ;;  %s1807_s29 = sshll.u32 %s2889_s22, 6 }
 0x1ee   : > { %s2825_s13 = scalar_lea.vmem %s2858_s12, %s1807_s29 }
 0x1ef   : > { %v2625_v51 = vpop.permute.xlu0 %1138  ;;  %v2627_v52 = vpop.permute.xlu1 %1125 }
 0x1f1   : > { %1379 = vrot.lane.b32.xlu1 %v2496_v34, %s2167_s23 }
 0x1f3   : > { %v2631_v53 = vpop.permute.xlu0 %1934  ;;  %v2633_v54 = vpop.permute.xlu1 %1929 }
 0x1f4   : > { %v1937_v15 = vunpack.i.h.bf16 %v2631_v53  ;;  %v1932_v17 = vunpack.i.h.bf16 %v2633_v54 }
 0x1f7   : > { %v2635_v55 = vpop.permute.xlu0 %1187  ;;  %v2637_v62 = vpop.permute.xlu1 %1939 }
 0x1f8   : > { %v1942_v41 = vunpack.i.h.bf16 %v2637_v62 }
 0x1fb   : > { %v2639_v63 = vpop.permute.xlu0 %1944  ;;  %v2641_v27 = vpop.permute.xlu1 %1200 }
 0x1fc   : > { %v1947_v35 = vunpack.i.h.bf16 %v2639_v63 }
 0x1ff   : > { %v2643_v58 = vpop.permute.xlu0 %1954  ;;  %v2645_v1 = vpop.permute.xlu1 %1949 }
 0x203   : > { %v2647_v20 = vpop.permute.xlu0 %1262  ;;  %v2649_v23 = vpop.permute.xlu1 %1249 }
 0x207   : > { %v2651_v3 = vpop.permute.xlu0 %1964  ;;  %v2653_v24 = vpop.permute.xlu1 %1959 }
 0x20b   : > { %v2655_v4 = vpop.permute.xlu0 %1311  ;;  %v2657_v25 = vpop.permute.xlu1 %1299 }
 0x20f   : > { %v2659_v6 = vpop.permute.xlu1 %1324  ;;  %v1975_v7 = vpop.permute.xlu0 %1974 }
 0x210   : > { %v1977_v26 = vunpack.i.h.bf16 %v1975_v7  ;;  %v1976_v12 = vunpack.i.l.bf16 %v1975_v7 }
 0x212   : > { %v855_v21 = vsel %vm854_vm13, %v1977_v26, %v1937_v15  ;;  %v856_v29 = vsel %vm854_vm13, %v1937_v15, %v1976_v12  ;;  %v1952_v26 = vunpack.i.h.bf16 %v2645_v1 }
 0x213   : > { %v2666_v10 = vpop.permute.xlu1 %1578  ;;  %v1985_v61 = vpop.permute.xlu0 %1984 }
 0x214   : > { %v1587_v16 = vmax.f32 %v1559_v60, %v2666_v10  ;;  %v1987_v31 = vunpack.i.h.bf16 %v1985_v61  ;;  %v1986_v32 = vunpack.i.l.bf16 %v1985_v61 }
 0x216   : > { %v1599_v39 = vmax.f32 %v1587_v16, %v2371_v49  ;;  %v884_v60 = vsel %vm883_vm14, %v1987_v31, %v1947_v35  ;;  %v885_v11 = vsel %vm883_vm14, %v1947_v35, %v1986_v32  ;;  %v1957_v16 = vunpack.i.h.bf16 %v2643_v58 }
 0x217   : > { %v1995_v28 = vpop.permute.xlu0 %1994  ;;  %v1970_v34 = vpop.permute.xlu1 %1969  ;;  %v1962_v35 = vunpack.i.h.bf16 %v2653_v24 }
 0x218   : > { %v1972_v18 = vunpack.i.h.bf16 %v1970_v34  ;;  %v1971_v19 = vunpack.i.l.bf16 %v1970_v34  ;;  %v1619_v49 = vmul.f32 %v1613_v48, %v1599_v39  ;;  %v1997_v8 = vunpack.i.h.bf16 %v1995_v28 }
 0x219   : > { %v1996_v59 = vunpack.i.l.bf16 %v1995_v28  ;;  %v1581_v28 = vrot.slane %v2666_v10, 4  ;;  %v1967_v10 = vunpack.i.h.bf16 %v2651_v3 }
 0x21a   : > { %v839_v33 = vsel %vm838_vm15, %v1972_v18, %v1932_v17  ;;  %v840_v36 = vsel %vm838_vm15, %v1932_v17, %v1971_v19  ;;  %1634 = vrot.lane.b32.xlu1 %v1619_v49, %s2152_s26  ;;  %v909_v19 = vsel %vm908_vm0, %v1997_v8, %v1957_v16  ;;  %v1389_v8 = vld [vmem:[%s2851_s5 + $0x8] sm:$0xff] }
 0x21b   : > { %v1825_v37 = vpack.c.bf16 %v855_v21, %v839_v33  ;;  %v2005_v38 = vpop.permute.xlu0 %2004  ;;  %v1980_v47 = vpop.permute.xlu1 %1979  ;;  %v1823_v40 = vpack.c.bf16 %v856_v29, %v840_v36  ;;  %v910_v49 = vsel %vm908_vm0, %v1957_v16, %v1996_v59  ;;  %v1595_v59 = vsel %vm1193_vm1, %v2526_v22, %v2671_v13  ;;  %1800 = vmatprep.mubr.msk.f32.mxu1 %vm979_vm7, %v1389_v8 }
 0x21c   : > { %v1982_v5 = vunpack.i.h.bf16 %v1980_v47  ;;  %v1981_v7 = vunpack.i.l.bf16 %v1980_v47  ;;  %v2007_v21 = vunpack.i.h.bf16 %v2005_v38  ;;  %v2006_v29 = vunpack.i.l.bf16 %v2005_v38 }
 0x21d   : > { %1824 = vmatprep.subr.bf16.mxu0 %v1823_v40  ;;  %v1615_v16 = vsel %vm1614_vm8, %v1613_v48, %v2603_v42 }
 0x21e   : > { %v871_v9 = vsel %vm870_vm4, %v1982_v5, %v1942_v41  ;;  %1826 = vmatpush1.bf16.msra.mxu0 %v1825_v37  ;;  %v872_v61 = vsel %vm870_vm4, %v1942_v41, %v1981_v7 }
 0x21f   : > { %v1829_v12 = vpack.c.bf16 %v884_v60, %v871_v9  ;;  %v1577_v14 = vpop.permute.xlu0 %1576  ;;  %v1990_v39 = vpop.permute.xlu1 %1989  ;;  %v1827_v15 = vpack.c.bf16 %v885_v11, %v872_v61  ;;  %v935_v60 = vsel %vm934_vm2, %v2007_v21, %v1967_v10  ;;  %v936_v11 = vsel %vm934_vm2, %v1967_v10, %v2006_v29  ;;  %v437_v21 = vld [vmem:[%s2848_s2] sm:$0xff] }
 0x220   : > { %v1580_v34 = vrot.slane %v1577_v14, 4  ;;  %v1992_v17 = vunpack.i.h.bf16 %v1990_v39  ;;  %v1991_v18 = vunpack.i.l.bf16 %v1990_v39 }
 0x221   : > { %1828 = vmatprep.subr.bf16.mxu0 %v1827_v15 }
 0x222   : > { %v1582_v31 = vsel %vm2872_vm6, %v1580_v34, %v1581_v28  ;;  %v896_v32 = vsel %vm656_vm9, %v1992_v17, %v1952_v26  ;;  %1830 = vmatpush1.bf16.msra.mxu0 %v1829_v12  ;;  %v897_v33 = vsel %vm656_vm9, %v1952_v26, %v1991_v18  ;;  %vm947_vm6 = vcmask 515072   ;;  %v973_v34 = vld [vmem:[%s2850_s4] sm:$0xff] }
 0x223   : > { %v1583_v36 = vsel %vm1115_vm5, %v1577_v14, %v1582_v31  ;;  %v1833_v37 = vpack.c.bf16 %v909_v19, %v896_v32  ;;  %v2704_v47 = vpop.permute.xlu0 %1337  ;;  %v2000_v40 = vpop.permute.xlu1 %1999  ;;  %v1831_v41 = vpack.c.bf16 %v910_v49, %v897_v33  ;;  %v954_v18 = vld [vmem:[%s2849_s3] sm:$0xff] }
 0x224   : > { %v1586_v5 = vmax.f32 %v1558_v30, %v1583_v36  ;;  %v2002_v38 = vunpack.i.h.bf16 %v2000_v40  ;;  %v2001_v7 = vunpack.i.l.bf16 %v2000_v40 }
 0x225   : > { %1832 = vmatprep.subr.bf16.mxu0 %v1831_v41 }
 0x226   : > { %v1598_v9 = vmax.f32 %v1586_v5, %v1595_v59  ;;  %v922_v61 = vsel %vm921_vm12, %v2002_v38, %v1962_v35  ;;  %1834 = vmatpush1.bf16.msra.mxu0 %v1833_v37  ;;  %v923_v30 = vsel %vm921_vm12, %v1962_v35, %v2001_v7 }
 0x227   : > { %v1837_v26 = vpack.c.bf16 %v935_v60, %v922_v61  ;;  %v2722_v22 = vpop.permute.xlu0 %1362  ;;  %v2724_v13 = vpop.permute.xlu1 %1350  ;;  %v1835_v12 = vpack.c.bf16 %v936_v11, %v923_v30 }
 0x228   : > { %v1618_v14 = vmul.f32 %v1615_v16, %v1598_v9 }
 0x229   : > { %1836 = vmatprep.subr.bf16.mxu0 %v1835_v12 }
 0x22a   : > { %1630 = vrot.lane.b32.xlu1 %v1618_v14, %s2152_s26  ;;  %1838 = vmatpush1.bf16.msra.mxu0 %v1837_v26  ;;  %v1629_v39 = vcombine.high %v1618_v14, %v1618_v14 }
 0x22b   : > { %v946_v15 = vpop.permute.xlu0 %945  ;;  %v944_v28 = vpop.permute.xlu1 %943 }
 0x22c   : > { %1632 = vrot.lane.b32.xlu0 %v1629_v39, %s2152_s26  ;;  %v949_v42 = vsel %vm947_vm6, %v944_v28, %v946_v15 }
 0x22d   : > { %999 = vmatprep.subr.mxu0 %v949_v42 }
 0x22e   : > { %976 = vperm.xlu1 %1926, %v973_v34  }
 0x22f   : > { %v2732_v48 = vpop.permute.xlu0 %1377  ;;  %v942_v17 = vpop.permute.xlu1 %941 }
 0x230   : > { %v948_v19 = vsel %vm947_vm6, %v942_v17, %v944_v28  ;;  %1375 = vrot.lane.b32.xlu0 %v2451_v2, %s2167_s23  ;;  %v1621_v2 = vld [vmem:[%s2854_s8] sm:$0xff]  ;;  %v1931_v17 = vunpack.i.l.bf16 %v2633_v54  ;;  %v1941_v54 = vunpack.i.l.bf16 %v2637_v62  ;;  %v1946_v62 = vunpack.i.l.bf16 %v2639_v63 }
 0x231   : > { %1000 = vmatpush1.msra.mxu0 %v948_v19  ;;  %v1956_v63 = vunpack.i.l.bf16 %v2643_v58 }
 0x232   : > { %1799 = vmatmul.mubr.msk.f32.vlgmr.msra.gmra.mrb[12].mxu0 %vm979_vm7, %v954_v18  ;;  %vm1099_vm7 = vcmask 916480  }
 0x233   : > { %v2015_v49 = vpop.permute.xlu0 %2014  ;;  %v2010_v29 = vpop.permute.xlu1 %2009  ;;  %1709 = vmatprep.mubr.f32.mxu0 %v2137_v0 }
 0x234   : > { %v2017_v31 = vunpack.i.h.bf16 %v2015_v49  ;;  %v2016_v32 = vunpack.i.l.bf16 %v2015_v49  ;;  %v2012_v33 = vunpack.i.h.bf16 %v2010_v29  ;;  %v2011_v10 = vunpack.i.l.bf16 %v2010_v29  ;;  %442 = vperm.xlu0 %1927, %v437_v21  }
 0x236   : > { %v1069_v36 = vsel %vm1067_vm10, %v2011_v10, %v2012_v33  ;;  %v1085_v37 = vsel %vm1083_vm11, %v2016_v32, %v2017_v31  ;;  %v1068_v40 = vsel %vm1067_vm10, %v2611_v44, %v2011_v10  ;;  %v1084_v41 = vsel %vm1083_vm11, %v2609_v43, %v2016_v32 }
 0x237   : > { %v2025_v0 = vpop.permute.xlu0 %2024  ;;  %v2020_v35 = vpop.permute.xlu1 %2019  ;;  %v1839_v5 = vpack.c.bf16 %v1085_v37, %v1069_v36  ;;  %v1841_v38 = vpack.c.bf16 %v1084_v41, %v1068_v40  ;;  %vm1131_vm10 = vcmask 900096   ;;  %vm1144_vm11 = vcmask 801792  }
 0x238   : > { %v2027_v7 = vunpack.i.h.bf16 %v2025_v0  ;;  %v2026_v8 = vunpack.i.l.bf16 %v2025_v0  ;;  %v2022_v59 = vunpack.i.h.bf16 %v2020_v35  ;;  %v2021_v60 = vunpack.i.l.bf16 %v2020_v35  ;;  %1624 = vperm.xlu0 %1927, %v1621_v2  }
 0x239   : > { %1840 = vmatprep.subr.bf16.mxu1 %v1839_v5 }
 0x23a   : > { %1842 = vmatpush1.bf16.msra.mxu1 %v1841_v38  ;;  %v1101_v9 = vsel %vm1099_vm7, %v2021_v60, %v2022_v59  ;;  %v1117_v61 = vsel %vm1115_vm5, %v2026_v8, %v2027_v7  ;;  %v1100_v44 = vsel %vm1099_vm7, %v2619_v46, %v2021_v60  ;;  %v1116_v43 = vsel %vm1115_vm5, %v2617_v45, %v2026_v8 }
 0x23b   : > { %v2035_v30 = vpop.permute.xlu0 %2034  ;;  %v2030_v11 = vpop.permute.xlu1 %2029  ;;  %v1843_v16 = vpack.c.bf16 %v1117_v61, %v1101_v9  ;;  %v1845_v26 = vpack.c.bf16 %v1116_v43, %v1100_v44  ;;  %v1936_v45 = vunpack.i.l.bf16 %v2631_v53  ;;  %vm1381_vm5 = vcmask 375808  }
 0x23c   : > { %v2037_v12 = vunpack.i.h.bf16 %v2035_v30  ;;  %v2036_v14 = vunpack.i.l.bf16 %v2035_v30  ;;  %v2032_v39 = vunpack.i.h.bf16 %v2030_v11  ;;  %v2031_v15 = vunpack.i.l.bf16 %v2030_v11 }
 0x23d   : > { %1844 = vmatprep.subr.bf16.mxu1 %v1843_v16 }
 0x23e   : > { %1846 = vmatpush1.bf16.msra.mxu1 %v1845_v26  ;;  %v1133_v28 = vsel %vm1131_vm10, %v2031_v15, %v2032_v39  ;;  %v1146_v34 = vsel %vm1144_vm11, %v2036_v14, %v2037_v12  ;;  %v1132_v42 = vsel %vm1131_vm10, %v2627_v52, %v2031_v15  ;;  %v1145_v46 = vsel %vm1144_vm11, %v2625_v51, %v2036_v14 }
 0x23f   : > { %v2045_v18 = vpop.permute.xlu0 %2044  ;;  %v2040_v19 = vpop.permute.xlu1 %2039  ;;  %v1847_v21 = vpack.c.bf16 %v1146_v34, %v1133_v28  ;;  %v1849_v49 = vpack.c.bf16 %v1145_v46, %v1132_v42  ;;  %v1951_v39 = vunpack.i.l.bf16 %v2645_v1 }
 0x240   : > { %v2047_v29 = vunpack.i.h.bf16 %v2045_v18  ;;  %v2046_v31 = vunpack.i.l.bf16 %v2045_v18  ;;  %v2042_v32 = vunpack.i.h.bf16 %v2040_v19  ;;  %v2041_v33 = vunpack.i.l.bf16 %v2040_v19 }
 0x241   : > { %1848 = vmatprep.subr.bf16.mxu1 %v1847_v21 }
 0x242   : > { %1850 = vmatpush1.bf16.msra.mxu1 %v1849_v49  ;;  %v1158_v10 = vsel %vm838_vm15, %v2041_v33, %v2042_v32  ;;  %v1170_v52 = vsel %vm854_vm13, %v2046_v31, %v2047_v29  ;;  %v1157_v51 = vsel %vm838_vm15, %v1931_v17, %v2041_v33  ;;  %v1169_v53 = vsel %vm854_vm13, %v1936_v45, %v2046_v31 }
 0x243   : > { %v2055_v2 = vpop.permute.xlu0 %2054  ;;  %v2050_v36 = vpop.permute.xlu1 %2049  ;;  %v1851_v37 = vpack.c.bf16 %v1170_v52, %v1158_v10  ;;  %v1853_v40 = vpack.c.bf16 %v1169_v53, %v1157_v51  ;;  %vm1206_vm13 = vcmask 670720  }
 0x244   : > { %v2057_v41 = vunpack.i.h.bf16 %v2055_v2  ;;  %v2056_v0 = vunpack.i.l.bf16 %v2055_v2  ;;  %v2052_v35 = vunpack.i.h.bf16 %v2050_v36  ;;  %v2051_v5 = vunpack.i.l.bf16 %v2050_v36 }
 0x245   : > { %1852 = vmatprep.subr.bf16.mxu1 %v1851_v37  ;;  %v1966_v36 = vunpack.i.l.bf16 %v2651_v3  ;;  %v1961_v37 = vunpack.i.l.bf16 %v2653_v24 }
 0x246   : > { %1854 = vmatpush1.bf16.msra.mxu1 %v1853_v40  ;;  %v1182_v38 = vsel %vm870_vm4, %v2051_v5, %v2052_v35  ;;  %v1195_v7 = vsel %vm1193_vm1, %v2056_v0, %v2057_v41  ;;  %v1181_v8 = vsel %vm870_vm4, %v1941_v54, %v2051_v5  ;;  %v1194_v59 = vsel %vm1193_vm1, %v2635_v55, %v2056_v0 }
 0x247   : > { %v2065_v60 = vpop.permute.xlu0 %2064  ;;  %v2060_v9 = vpop.permute.xlu1 %2059  ;;  %v1855_v61 = vpack.c.bf16 %v1195_v7, %v1182_v38  ;;  %v1857_v44 = vpack.c.bf16 %v1194_v59, %v1181_v8  ;;  %vm1268_vm1 = vcmask 539648   ;;  %vm1343_vm4 = vcmask 400384  }
 0x248   : > { %v2067_v43 = vunpack.i.h.bf16 %v2065_v60  ;;  %v2066_v30 = vunpack.i.l.bf16 %v2065_v60  ;;  %v2062_v11 = vunpack.i.h.bf16 %v2060_v9  ;;  %v2061_v16 = vunpack.i.l.bf16 %v2060_v9 }
 0x249   : > { %1856 = vmatprep.subr.bf16.mxu1 %v1855_v61 }
 0x24a   : > { %1858 = vmatpush1.bf16.msra.mxu1 %v1857_v44  ;;  %v1208_v26 = vsel %vm1206_vm13, %v2061_v16, %v2062_v11  ;;  %v1220_v12 = vsel %vm883_vm14, %v2066_v30, %v2067_v43  ;;  %v1207_v14 = vsel %vm1206_vm13, %v2641_v27, %v2061_v16  ;;  %v1219_v55 = vsel %vm883_vm14, %v1946_v62, %v2066_v30 }
 0x24b   : > { %v2075_v15 = vpop.permute.xlu0 %2074  ;;  %v2070_v28 = vpop.permute.xlu1 %2069  ;;  %v1859_v34 = vpack.c.bf16 %v1220_v12, %v1208_v26  ;;  %v1861_v42 = vpack.c.bf16 %v1219_v55, %v1207_v14  ;;  %vm1255_vm14 = vcmask 637952  }
 0x24c   : > { %v2077_v46 = vunpack.i.h.bf16 %v2075_v15  ;;  %v2076_v45 = vunpack.i.l.bf16 %v2075_v15  ;;  %v2072_v17 = vunpack.i.h.bf16 %v2070_v28  ;;  %v2071_v18 = vunpack.i.l.bf16 %v2070_v28 }
 0x24d   : > { %1860 = vmatprep.subr.bf16.mxu1 %v1859_v34 }
 0x24e   : > { %1862 = vmatpush1.bf16.msra.mxu1 %v1861_v42  ;;  %v1232_v19 = vsel %vm656_vm9, %v2071_v18, %v2072_v17  ;;  %v1244_v27 = vsel %vm908_vm0, %v2076_v45, %v2077_v46  ;;  %v1231_v21 = vsel %vm656_vm9, %v1951_v39, %v2071_v18  ;;  %v1243_v58 = vsel %vm908_vm0, %v1956_v63, %v2076_v45 }
 0x24f   : > { %v2085_v49 = vpop.permute.xlu0 %2084  ;;  %v2080_v1 = vpop.permute.xlu1 %2079  ;;  %v1863_v29 = vpack.c.bf16 %v1244_v27, %v1232_v19  ;;  %v1865_v31 = vpack.c.bf16 %v1243_v58, %v1231_v21  ;;  %vm1317_vm0 = vcmask 506880  }
 0x250   : > { %v2087_v32 = vunpack.i.h.bf16 %v2085_v49  ;;  %v2086_v33 = vunpack.i.l.bf16 %v2085_v49  ;;  %v2082_v10 = vunpack.i.h.bf16 %v2080_v1  ;;  %v2081_v52 = vunpack.i.l.bf16 %v2080_v1 }
 0x251   : > { %1864 = vmatprep.subr.bf16.mxu1 %v1863_v29 }
 0x252   : > { %1866 = vmatpush1.bf16.msra.mxu1 %v1865_v31  ;;  %v1257_v51 = vsel %vm1255_vm14, %v2081_v52, %v2082_v10  ;;  %v1270_v53 = vsel %vm1268_vm1, %v2086_v33, %v2087_v32  ;;  %v1256_v54 = vsel %vm1255_vm14, %v2649_v23, %v2081_v52  ;;  %v1269_v2 = vsel %vm1268_vm1, %v2647_v20, %v2086_v33 }
 0x253   : > { %v2095_v40 = vpop.permute.xlu0 %2094  ;;  %v2090_v41 = vpop.permute.xlu1 %2089  ;;  %v1867_v0 = vpack.c.bf16 %v1270_v53, %v1257_v51  ;;  %v1869_v35 = vpack.c.bf16 %v1269_v2, %v1256_v54 }
 0x254   : > { %v2097_v5 = vunpack.i.h.bf16 %v2095_v40  ;;  %v2096_v38 = vunpack.i.l.bf16 %v2095_v40  ;;  %v2092_v7 = vunpack.i.h.bf16 %v2090_v41  ;;  %v2091_v8 = vunpack.i.l.bf16 %v2090_v41 }
 0x255   : > { %1868 = vmatprep.subr.bf16.mxu1 %v1867_v0 }
 0x256   : > { %1870 = vmatpush1.bf16.msra.mxu1 %v1869_v35  ;;  %v1282_v59 = vsel %vm921_vm12, %v2091_v8, %v2092_v7  ;;  %v1294_v23 = vsel %vm934_vm2, %v2096_v38, %v2097_v5  ;;  %v1281_v20 = vsel %vm921_vm12, %v1961_v37, %v2091_v8  ;;  %v1293_v3 = vsel %vm934_vm2, %v1966_v36, %v2096_v38  ;;  %v1388_v37 = vld [vmem:[%s2851_s5] sm:$0xff] }
 0x257   : > { %v2105_v62 = vpop.permute.xlu0 %2104  ;;  %v2100_v24 = vpop.permute.xlu1 %2099  ;;  %v1871_v60 = vpack.c.bf16 %v1294_v23, %v1282_v59  ;;  %v1873_v9 = vpack.c.bf16 %v1293_v3, %v1281_v20  ;;  %vm1330_vm2 = vcmask 408576   ;;  %vm2887_vm12 = vcmask 31744  }
 0x258   : > { %v2107_v61 = vunpack.i.h.bf16 %v2105_v62  ;;  %v2106_v44 = vunpack.i.l.bf16 %v2105_v62  ;;  %v2102_v43 = vunpack.i.h.bf16 %v2100_v24  ;;  %v2101_v30 = vunpack.i.l.bf16 %v2100_v24 }
 0x259   : > { %1872 = vmatprep.subr.bf16.mxu1 %v1871_v60 }
 0x25a   : > { %1874 = vmatpush1.bf16.msra.mxu1 %v1873_v9  ;;  %v1306_v11 = vsel %vm947_vm6, %v2101_v30, %v2102_v43  ;;  %v1319_v16 = vsel %vm1317_vm0, %v2106_v44, %v2107_v61  ;;  %v1305_v26 = vsel %vm947_vm6, %v2657_v25, %v2101_v30  ;;  %v1318_v12 = vsel %vm1317_vm0, %v2655_v4, %v2106_v44 }
 0x25b   : > { %v2115_v14 = vpop.permute.xlu0 %2114  ;;  %v2110_v55 = vpop.permute.xlu1 %2109  ;;  %v1875_v63 = vpack.c.bf16 %v1319_v16, %v1306_v11  ;;  %v1877_v39 = vpack.c.bf16 %v1318_v12, %v1305_v26  ;;  %vm1368_vm6 = vcmask 384000   ;;  %v1440_v11 = vld [vmem:[%s2852_s6] sm:$0xff]  ;;  %v1441_v26 = vld [vmem:[%s2852_s6 + $0x8] sm:$0xff] }
 0x25c   : > { %v2117_v15 = vunpack.i.h.bf16 %v2115_v14  ;;  %v2116_v28 = vunpack.i.l.bf16 %v2115_v14  ;;  %v2112_v34 = vunpack.i.h.bf16 %v2110_v55  ;;  %v2111_v42 = vunpack.i.l.bf16 %v2110_v55 }
 0x25d   : > { %1876 = vmatprep.subr.bf16.mxu1 %v1875_v63 }
 0x25e   : > { %1878 = vmatpush1.bf16.msra.mxu1 %v1877_v39  ;;  %v1332_v46 = vsel %vm1330_vm2, %v2111_v42, %v2112_v34  ;;  %v1345_v45 = vsel %vm1343_vm4, %v2116_v28, %v2117_v15  ;;  %v1331_v17 = vsel %vm1330_vm2, %v2659_v6, %v2111_v42  ;;  %v1344_v25 = vsel %vm1343_vm4, %v2704_v47, %v2116_v28 }
 0x25f   : > { %v2125_v18 = vpop.permute.xlu0 %2124  ;;  %v2120_v4 = vpop.permute.xlu1 %2119  ;;  %v1879_v19 = vpack.c.bf16 %v1345_v45, %v1332_v46  ;;  %v1881_v27 = vpack.c.bf16 %v1344_v25, %v1331_v17 }
 0x260   : > { %v2127_v21 = vunpack.i.h.bf16 %v2125_v18  ;;  %v2126_v58 = vunpack.i.l.bf16 %v2125_v18  ;;  %v2122_v49 = vunpack.i.h.bf16 %v2120_v4  ;;  %v2121_v1 = vunpack.i.l.bf16 %v2120_v4 }
 0x261   : > { %1880 = vmatprep.subr.bf16.mxu1 %v1879_v19 }
 0x262   : > { %1882 = vmatpush1.bf16.msra.mxu1 %v1881_v27  ;;  %v1357_v29 = vsel %vm422_vm3, %v2121_v1, %v2122_v49  ;;  %v1370_v31 = vsel %vm1368_vm6, %v2126_v58, %v2127_v21  ;;  %v1356_v32 = vsel %vm422_vm3, %v2724_v13, %v2121_v1  ;;  %v1369_v6 = vsel %vm1368_vm6, %v2722_v22, %v2126_v58  ;;  %v1620_v22 = vld [vmem:[%s2853_s7] sm:$0xff] }
 0x263   : > { %v1380_v47 = vpop.permute.xlu1 %1379  ;;  %v1883_v33 = vpack.c.bf16 %v1370_v31, %v1357_v29  ;;  %v1885_v10 = vpack.c.bf16 %v1369_v6, %v1356_v32  ;;  %vm2885_vm3 = vcmask 1043456  }
 0x264   : > { %v1383_v52 = vsel %vm1381_vm5, %v2732_v48, %v1380_v47  ;;  %vm2886_vm8 = vmmov %vm2885_vm3 }
 0x265   : > { %1884 = vmatprep.subr.bf16.mxu1 %v1883_v33 }
 0x266   : > { %1886 = vmatpush1.bf16.msra.mxu1 %v1885_v10 }
 0x267   : > { %1493 = vmatprep.subr.mxu1 %v1383_v52 }
 0x28c   : > { %v1635_v51 = vpop.permute.xlu1 %1634 }
 0x29c   : > { %v1631_v53 = vpop.permute.xlu1 %1630 }
 0x29e   : > { %v1633_v54 = vpop.permute.xlu0 %1632 }
 0x29f   : > { %v1636_v2 = vsel %vm838_vm15, %v1631_v53, %v1633_v54  ;;  %v1637_v36 = vsel %vm838_vm15, %v1633_v54, %v1635_v51 }
 0x2a0   : > { %1801 = vmatprep.subr.msk.mxu0 %vm2885_vm3, %v1637_v36 }
 0x2a1   : > { %1802 = vmatpush1.msk.msra.mxu0 %vm2886_vm8, %v1636_v2 }
 0x2a2   : > { %v1376_v13 = vpop.permute.xlu0 %1375  ;;  %1803 = vmatmul.mubr.msk.f32.vlgmr.msra.gmra.mrb[14].mxu0 %vm2887_vm12, %v1620_v22 }
 0x2a3   : > { %v1382_v40 = vsel %vm1381_vm5, %v1376_v13, %v2732_v48 }
 0x2a4   : > { %1494 = vmatpush1.msra.mxu1 %v1382_v40 }
 0x2a5   : > { %1510 = vmatmul.mubr.f32.vlgmr.msra.gmra.mrb[0].mxu1 %v1388_v37 }
 0x2ad   : > { %v977_v48 = vpop.permute.xlu1 %976 }
 0x2b3   : > { %v443_v41 = vpop.permute.xlu0 %442 }
 0x2b4   : > { %v542_v0 = vadd.f32 %v2376_v56, %v443_v41  ;;  %v544_v35 = vadd.f32 %v2378_v57, %v443_v41  ;;  %v625_v5 = vadd.f32 %v2423_v50, %v443_v41 }
 0x2b6   : > { %v639_v38 = vmax.f32 %v544_v35, 0.0  ;;  %v638_v7 = vmax.f32 %v542_v0, 0.0  ;;  %v640_v8 = vmax.f32 %v625_v5, 0.0 }
 0x2b7   : > { %v1625_v3 = vpop.permute.xlu0 %1624 }
 0x2b8   : > { %652 = vrot.lane.b32.xlu0 %v639_v38, %s2157_s14  ;;  %650 = vrot.lane.b32.xlu1 %v638_v7, %s2157_s14 }
 0x2bc   : > { %654 = vrot.lane.b32.xlu1 %v640_v8, %s2157_s14 }
 0x305   : > { %v1049_v59 = vpop.f32.mrb[12].mxu0 }
 0x306   : > { %v1050_v23 = vadd.f32 %v1049_v59, %v977_v48  ;;  %v1051_v20 = vpop.f32.mrb[13].mxu0 }
 0x307   : > { %v1052_v56 = vadd.f32 %v1051_v20, %v977_v48 }
 0x308   : > { %v1054_v57 = vmax.f32 %v1050_v23, 0.0 }
 0x309   : > { %v1055_v50 = vmax.f32 %v1052_v56, 0.0 }
 0x30a   : > { %1056 = vst [vmem:[%s2825_s13 + $0x10] sm:$0xff] %v1054_v57 }
 0x30b   : > { %1057 = vst [vmem:[%s2825_s13 + $0x18] sm:$0xff] %v1055_v50 }
 0x32a   : > { %v653_v62 = vpop.permute.xlu0 %652  ;;  %v651_v24 = vpop.permute.xlu1 %650 }
 0x32b   : > { %v657_v60 = vsel %vm656_vm9, %v651_v24, %v653_v62 }
 0x32c   : > { %661 = vst [vmem:[%s2825_s13] sm:$0xff] %v657_v60 }
 0x32e   : > { %v655_v9 = vpop.permute.xlu1 %654 }
 0x32f   : > { %v658_v61 = vsel %vm656_vm9, %v653_v62, %v655_v9 }
 0x330   : > { %662 = vst [vmem:[%s2825_s13 + $0x8] sm:$0xff] %v658_v61 }
 0x375   : > { %v1711_v44 = vpop.f32.mrb[14].mxu0 }
 0x376   : > { %v1712_v43 = vadd.f32 %v1711_v44, %v1625_v3  ;;  %v1713_v30 = vpop.f32.mrb[15].mxu0 }
 0x377   : > { %v1714_v16 = vadd.f32 %v1713_v30, %v1625_v3 }
 0x378   : > { %v1716_v12 = vmax.f32 %v1712_v43, 0.0  ;;  %v1511_v14 = vpop.f32.mrb[0].mxu1 }
 0x379   : > { %v1717_v55 = vmax.f32 %v1714_v16, 0.0  ;;  %v1512_v63 = vadd.f32 %v1511_v14, %v1440_v11  ;;  %v1513_v39 = vpop.f32.mrb[1].mxu1 }
 0x37a   : > { %1718 = vst [vmem:[%s2825_s13 + $0x30] sm:$0xff] %v1716_v12  ;;  %v1514_v15 = vadd.f32 %v1513_v39, %v1441_v26 }
 0x37b   : > { %1719 = vst [vmem:[%s2825_s13 + $0x38] sm:$0xff] %v1717_v55  ;;  %v1516_v28 = vmax.f32 %v1512_v63, 0.0 }
 0x37c   : > { %v1517_v34 = vmax.f32 %v1514_v15, 0.0 }
 0x37d   : > { %1518 = vst [vmem:[%s2825_s13 + $0x20] sm:$0xff] %v1516_v28 }
 0x37e   : > { %1519 = vst [vmem:[%s2825_s13 + $0x28] sm:$0xff] %v1517_v34 }
 0x37f PF: > { %s22_s21 = sadd.s32 1, %s2135_s21  }
 0x380   : > { %p19_p4 = scmp.ge.s32.totalorder %s22_s21, 4  }
 0x382   :  { %21 = sbr.rel (!%p19_p4) target bundleno = 1 (0x1), region = 104 }

</bundles_post_ra>
